<compile_context>
chip_gen: v7x
topology: tpu7x:2x2x1
jax: 0.10.0
libtpu: 0.0.40
codegen_flags: <defaults>
</compile_context>

<pallas_src>
import jax
import jax.numpy as jnp
from jax.experimental import pallas as pl
from jax.experimental.pallas import tpu as pltpu

EPS = 1e-5


# ---------------------------------------------------------------------------
# Fused Pallas kernel: fc1 -> (+BN1 shift) -> ReLU -> fc2 -> (+BN2 shift)
#                      -> ReLU -> last      (BN scales pre-folded into weights)
# ---------------------------------------------------------------------------
def _taskid_fused_kernel(x_ref, w1_ref, w2_ref, b_ref, wl_ref, o_ref):
    # x arrives as f32; cast to bf16 in-kernel (VPU cast hides under MXU slack,
    # no separate wrapper-side cast op / extra HBM round-trip).
    x = x_ref[...].astype(jnp.bfloat16)
    b = b_ref[...]                                   # (2, H) f32 folded BN shifts

    # fc1 (BN1 scale folded into columns) + shift + ReLU
    h = jnp.dot(x, w1_ref[...], preferred_element_type=jnp.float32)
    h = jnp.maximum(h + b[0:1, :], 0.0)

    # fc2 (BN2 scale folded into columns) + shift + ReLU
    h = jnp.dot(h.astype(jnp.bfloat16), w2_ref[...],
                preferred_element_type=jnp.float32)
    h = jnp.maximum(h + b[1:2, :], 0.0)

    # classifier head (output width padded to a lane-dense multiple of 128)
    o_ref[...] = jnp.dot(h.astype(jnp.bfloat16), wl_ref[...],
                         preferred_element_type=jnp.float32)


def _pick_batch_tile(B):
    """Single block for small batches (per-grid-step overhead and MXU M
    underfill dominate there); for large batches prefer tm=256 (fills the
    v6e/v7x 2x256^2 MXU), then 512, then 128."""
    if B <= 256 or B % 16 != 0:
        # TODO(synk): masked/padded-batch path for very large B that is not a
        # multiple of 16 (single full-batch block could exceed VMEM).
        return B
    for tm in (256, 512, 128):
        if B % tm == 0:
            return tm
    for tm in range(512, 15, -16):
        if B % tm == 0:
            return tm
    return B


def _vmem_capacity_bytes():
    try:
        return int(pltpu.get_tpu_info().vmem_capacity_bytes)
    except Exception:
        return 64 << 20  # conservative: v7x per-TensorCore VMEM


def _fused_call(x, prep, tm, vmem_limit, single_buffer_weights):
    B, H = x.shape
    n_pad = prep["wl"].shape[1]
    const_kw = ({"pipeline_mode": pl.Buffered(1)}
                if single_buffer_weights else {})

    def const_spec(shape):
        return pl.BlockSpec(shape, lambda i: (0, 0), **const_kw)

    return pl.pallas_call(
        _taskid_fused_kernel,
        out_shape=jax.ShapeDtypeStruct((B, n_pad), jnp.float32),
        grid_spec=pltpu.PrefetchScalarGridSpec(
            num_scalar_prefetch=0,
            grid=(B // tm,),
            in_specs=[
                pl.BlockSpec((tm, H), lambda i: (i, 0)),  # x batch tile (f32)
                const_spec((H, H)),                        # w1 (scale-folded, bf16)
                const_spec((H, H)),                        # w2 (scale-folded, bf16)
                const_spec((2, H)),                        # packed BN shifts (f32)
                const_spec((H, n_pad)),                    # head (padded, bf16)
            ],
            out_specs=pl.BlockSpec((tm, n_pad), lambda i: (i, 0)),
        ),
        compiler_params=pltpu.CompilerParams(
            dimension_semantics=("parallel",),
            vmem_limit_bytes=vmem_limit,
        ),
    )(x, prep["w1"], prep["w2"], prep["b"], prep["wl"])


def taskid_forward(x, prep):
    """x: (B, hidden) f32 -> logits (B, n_tasks) f32."""
    B, H = x.shape
    n_pad = prep["wl"].shape[1]
    tm = _pick_batch_tile(B)
    assert B % tm == 0

    budget = int(0.75 * _vmem_capacity_bytes())

    def estimate(weight_bufs):
        w_bytes = (prep["w1"].size + prep["w2"].size + prep["wl"].size) * 2
        b_bytes = prep["b"].size * 4
        act = tm * H * 8 + tm * n_pad * 4            # f32 h + bf16 copies + head acc
        io = 2 * (tm * H * 4 + tm * n_pad * 4)       # double-buffered x / out tiles
        return weight_bufs * (w_bytes + b_bytes) + io + act + (1 << 20)

    if estimate(1) > budget:
        # TODO(synk): K/N-tiled weight path (grid over the hidden dim + f32 VMEM
        # accumulator with pl.when init/finalize) for hidden sizes whose full
        # weight blocks exceed the per-core VMEM budget (esp. v7x's 64 MiB).
        raise NotImplementedError(
            "hidden_size too large for the fully-fused single-block kernel: "
            f"needs ~{estimate(1) >> 20} MiB VMEM, budget {budget >> 20} MiB")

    def run(single_buffer_weights):
        est = estimate(1 if single_buffer_weights else 2)
        vmem_limit = None if est < (12 << 20) else min(est, budget)
        return _fused_call(x, prep, tm, vmem_limit, single_buffer_weights)

    try:
        out = run(single_buffer_weights=True)
    except Exception:
        # Some jax/Mosaic builds reject pl.Buffered(1); fall back to default
        # double-buffering of the constant blocks (correct, slightly more VMEM).
        out = run(single_buffer_weights=False)
    return out[:, :prep["n_tasks"]]


# ---------------------------------------------------------------------------
# Parameters (torch layout) + one-time preprocessing
# ---------------------------------------------------------------------------
def init_params(key, hidden_size, n_tasks):
    ks = jax.random.split(key, 11)

    def lin(k, fan_out, fan_in):
        bound = 1.0 / (fan_in ** 0.5)
        return jax.random.uniform(k, (fan_out, fan_in), jnp.float32,
                                  -bound, bound)

    def bn(kg, kb, km, kv, n):
        gamma = 1.0 + 0.1 * jax.random.normal(kg, (n,), jnp.float32)
        beta = 0.1 * jax.random.normal(kb, (n,), jnp.float32)
        # non-trivial running statistics so the eval-mode BN path is exercised
        mean = 0.2 * jax.random.normal(km, (n,), jnp.float32)
        var = 0.5 + jax.random.uniform(kv, (n,), jnp.float32)
        return gamma, beta, mean, var

    return {
        "fc1_w": lin(ks[0], hidden_size, hidden_size),   # (out, in) torch layout
        "fc2_w": lin(ks[1], hidden_size, hidden_size),
        "last_w": lin(ks[2], n_tasks, hidden_size),
        "bn1": bn(ks[3], ks[4], ks[5], ks[6], hidden_size),
        "bn2": bn(ks[7], ks[8], ks[9], ks[10], hidden_size),
    }


def prepare_params(params):
    """Hoisted constant preprocessing: transpose to (in,out), fold BN running
    stats into the weights (scale, in f32 BEFORE the bf16 cast) and a packed
    (2,H) shift array, cast matmul operands to bf16, pad head width to 128."""
    def fold_bn(gamma, beta, mean, var):
        scale = gamma * jax.lax.rsqrt(var + EPS)
        shift = beta - mean * scale
        return scale, shift

    s1, b1 = fold_bn(*params["bn1"])
    s2, b2 = fold_bn(*params["bn2"])

    # BN scale folded into the output columns in f32, then a single bf16 cast
    # (avoids double rounding).
    w1 = (jnp.transpose(params["fc1_w"]) * s1[None, :]).astype(jnp.bfloat16)
    w2 = (jnp.transpose(params["fc2_w"]) * s2[None, :]).astype(jnp.bfloat16)

    wl = jnp.transpose(params["last_w"]).astype(jnp.bfloat16)   # (H, n_tasks)
    n_tasks = wl.shape[1]
    n_pad = ((n_tasks + 127) // 128) * 128
    wl = jnp.pad(wl, ((0, 0), (0, n_pad - n_tasks)))

    b = jnp.stack([b1, b2], axis=0).astype(jnp.float32)          # (2, H)
    return dict(w1=w1, w2=w2, b=b, wl=wl, n_tasks=n_tasks)


# ---------------------------------------------------------------------------
# Pure-JAX f32 reference (eval-mode module semantics)
# ---------------------------------------------------------------------------
def ref_forward(x, params):
    def bn_eval(h, gamma, beta, mean, var):
        return (h - mean) * jax.lax.rsqrt(var + EPS) * gamma + beta

    h = x @ params["fc1_w"].T
    h = jnp.maximum(bn_eval(h, *params["bn1"]), 0.0)
    h = h @ params["fc2_w"].T
    h = jnp.maximum(bn_eval(h, *params["bn2"]), 0.0)
    return h @ params["last_w"].T


# ---------------------------------------------------------------------------
if __name__ == "__main__":
    B, hidden_size, n_tasks = 32, 256, 8
    key = jax.random.PRNGKey(0)
    k_in, k_par = jax.random.split(key)

    x = jax.random.normal(k_in, (B, hidden_size), jnp.float32)
    params = init_params(k_par, hidden_size, n_tasks)
    prep = prepare_params(params)

    out = taskid_forward(x, prep)
    out = jax.block_until_ready(out)

    ref = ref_forward(x, params)
    assert out.shape == ref.shape == (B, n_tasks)
    # bf16 MXU operands vs f32 reference -> loose tolerance (documented).
    if not jnp.allclose(out, ref, rtol=2e-2, atol=2e-2):
        raise AssertionError("Pallas output mismatch vs JAX reference")

    print("KERNEL_OK")
</pallas_src>

<mosaic_0001>
module attributes {stable_mosaic.version = 11 : i64} {
  func.func @_taskid_fused_kernel(%arg0: i32, %arg1: memref<32x256xf32, #tpu.memory_space<vmem>>, %arg2: memref<256x256xbf16, #tpu.memory_space<vmem>>, %arg3: memref<256x256xbf16, #tpu.memory_space<vmem>>, %arg4: memref<2x256xf32, #tpu.memory_space<vmem>>, %arg5: memref<256x128xbf16, #tpu.memory_space<vmem>>, %arg6: memref<32x128xf32, #tpu.memory_space<vmem>>) attributes {dimension_semantics = [#tpu.dimension_semantics<parallel>], iteration_bounds = array<i64: 1>, scalar_prefetch = 0 : i64, scratch_operands = 0 : i64, tpu.core_type = #tpu.core_type<tc>, window_params = [{transform_indices = @transform_0, window_bounds = array<i64: 32, 256>}, {pipeline_mode = #tpu.pipeline_mode<synchronous>, transform_indices = @transform_1, window_bounds = array<i64: 256, 256>}, {pipeline_mode = #tpu.pipeline_mode<synchronous>, transform_indices = @transform_2, window_bounds = array<i64: 256, 256>}, {pipeline_mode = #tpu.pipeline_mode<synchronous>, transform_indices = @transform_3, window_bounds = array<i64: 2, 256>}, {pipeline_mode = #tpu.pipeline_mode<synchronous>, transform_indices = @transform_4, window_bounds = array<i64: 256, 128>}, {transform_indices = @transform_5, window_bounds = array<i64: 32, 128>}]} {
    %c0 = arith.constant 0 : index
    %c0_0 = arith.constant 0 : index
    %0 = vector.load %arg1[%c0, %c0_0] : memref<32x256xf32, #tpu.memory_space<vmem>>, vector<32x256xf32>
    %1 = arith.truncf %0 : vector<32x256xf32> to vector<32x256xbf16>
    %c0_1 = arith.constant 0 : index
    %c0_2 = arith.constant 0 : index
    %2 = vector.load %arg4[%c0_1, %c0_2] : memref<2x256xf32, #tpu.memory_space<vmem>>, vector<2x256xf32>
    %c0_3 = arith.constant 0 : index
    %c0_4 = arith.constant 0 : index
    %3 = vector.load %arg2[%c0_3, %c0_4] : memref<256x256xbf16, #tpu.memory_space<vmem>>, vector<256x256xbf16>
    %cst = arith.constant dense<0.000000e+00> : vector<32x256xf32>
    %4 = tpu.matmul %1, %3, %cst {dimension_numbers = #tpu.dot_dimension_numbers<[1], [0], [0], [1], [0, 0, 1, 1], [], []>} : vector<32x256xbf16>, vector<256x256xbf16>, vector<32x256xf32> -> vector<32x256xf32>
    %5 = vector.extract_strided_slice %2 {offsets = [0, 0], sizes = [1, 256], strides = [1, 1]} : vector<2x256xf32> to vector<1x256xf32>
    %6 = vector.broadcast %5 : vector<1x256xf32> to vector<32x256xf32>
    %7 = arith.addf %4, %6 : vector<32x256xf32>
    %cst_5 = arith.constant 0.000000e+00 : f32
    %8 = vector.broadcast %cst_5 : f32 to vector<32x256xf32>
    %9 = arith.maximumf %7, %8 : vector<32x256xf32>
    %10 = arith.truncf %9 : vector<32x256xf32> to vector<32x256xbf16>
    %c0_6 = arith.constant 0 : index
    %c0_7 = arith.constant 0 : index
    %11 = vector.load %arg3[%c0_6, %c0_7] : memref<256x256xbf16, #tpu.memory_space<vmem>>, vector<256x256xbf16>
    %cst_8 = arith.constant dense<0.000000e+00> : vector<32x256xf32>
    %12 = tpu.matmul %10, %11, %cst_8 {dimension_numbers = #tpu.dot_dimension_numbers<[1], [0], [0], [1], [0, 0, 1, 1], [], []>} : vector<32x256xbf16>, vector<256x256xbf16>, vector<32x256xf32> -> vector<32x256xf32>
    %13 = vector.extract_strided_slice %2 {offsets = [1, 0], sizes = [1, 256], strides = [1, 1]} : vector<2x256xf32> to vector<1x256xf32>
    %14 = vector.broadcast %13 : vector<1x256xf32> to vector<32x256xf32>
    %15 = arith.addf %12, %14 : vector<32x256xf32>
    %cst_9 = arith.constant 0.000000e+00 : f32
    %16 = vector.broadcast %cst_9 : f32 to vector<32x256xf32>
    %17 = arith.maximumf %15, %16 : vector<32x256xf32>
    %18 = arith.truncf %17 : vector<32x256xf32> to vector<32x256xbf16>
    %c0_10 = arith.constant 0 : index
    %c0_11 = arith.constant 0 : index
    %19 = vector.load %arg5[%c0_10, %c0_11] : memref<256x128xbf16, #tpu.memory_space<vmem>>, vector<256x128xbf16>
    %cst_12 = arith.constant dense<0.000000e+00> : vector<32x128xf32>
    %20 = tpu.matmul %18, %19, %cst_12 {dimension_numbers = #tpu.dot_dimension_numbers<[1], [0], [0], [1], [0, 0, 1, 1], [], []>} : vector<32x256xbf16>, vector<256x128xbf16>, vector<32x128xf32> -> vector<32x128xf32>
    %c0_13 = arith.constant 0 : index
    %c0_14 = arith.constant 0 : index
    %21 = vector.load %arg6[%c0_13, %c0_14] : memref<32x128xf32, #tpu.memory_space<vmem>>, vector<32x128xf32>
    tpu.vector_store %arg6[%c0_13, %c0_14], %20 {strides = array<i32>} : memref<32x128xf32, #tpu.memory_space<vmem>>, vector<32x128xf32>,
    return
  }
  func.func @transform_0(%arg0: i32) -> (i32, i32) {
    %c0_i32 = arith.constant 0 : i32
    %c0_i32_0 = arith.constant 0 : i32
    return %arg0, %c0_i32 : i32, i32
  }
  func.func @transform_1(%arg0: i32) -> (i32, i32) {
    %c0_i32 = arith.constant 0 : i32
    %c0_i32_0 = arith.constant 0 : i32
    %c0_i32_1 = arith.constant 0 : i32
    return %c0_i32, %c0_i32_0 : i32, i32
  }
  func.func @transform_2(%arg0: i32) -> (i32, i32) {
    %c0_i32 = arith.constant 0 : i32
    %c0_i32_0 = arith.constant 0 : i32
    %c0_i32_1 = arith.constant 0 : i32
    return %c0_i32, %c0_i32_0 : i32, i32
  }
  func.func @transform_3(%arg0: i32) -> (i32, i32) {
    %c0_i32 = arith.constant 0 : i32
    %c0_i32_0 = arith.constant 0 : i32
    %c0_i32_1 = arith.constant 0 : i32
    return %c0_i32, %c0_i32_0 : i32, i32
  }
  func.func @transform_4(%arg0: i32) -> (i32, i32) {
    %c0_i32 = arith.constant 0 : i32
    %c0_i32_0 = arith.constant 0 : i32
    %c0_i32_1 = arith.constant 0 : i32
    return %c0_i32, %c0_i32_0 : i32, i32
  }
  func.func @transform_5(%arg0: i32) -> (i32, i32) {
    %c0_i32 = arith.constant 0 : i32
    %c0_i32_0 = arith.constant 0 : i32
    return %arg0, %c0_i32 : i32, i32
  }
}

module attributes {stable_mosaic.version = 11 : i64} {
  func.func @_taskid_fused_kernel(%arg0: i32, %arg1: memref<32x256xf32, #tpu.memory_space<vmem>>, %arg2: memref<256x256xbf16, #tpu.memory_space<vmem>>, %arg3: memref<256x256xbf16, #tpu.memory_space<vmem>>, %arg4: memref<2x256xf32, #tpu.memory_space<vmem>>, %arg5: memref<256x128xbf16, #tpu.memory_space<vmem>>, %arg6: memref<32x128xf32, #tpu.memory_space<vmem>>) attributes {dimension_semantics = [#tpu.dimension_semantics<parallel>], iteration_bounds = array<i64: 1>, scalar_prefetch = 0 : i64, scratch_operands = 0 : i64, tpu.core_type = #tpu.core_type<tc>, window_params = [{transform_indices = @transform_0, window_bounds = array<i64: 32, 256>}, {pipeline_mode = #tpu.pipeline_mode<synchronous>, transform_indices = @transform_1, window_bounds = array<i64: 256, 256>}, {pipeline_mode = #tpu.pipeline_mode<synchronous>, transform_indices = @transform_2, window_bounds = array<i64: 256, 256>}, {pipeline_mode = #tpu.pipeline_mode<synchronous>, transform_indices = @transform_3, window_bounds = array<i64: 2, 256>}, {pipeline_mode = #tpu.pipeline_mode<synchronous>, transform_indices = @transform_4, window_bounds = array<i64: 256, 128>}, {transform_indices = @transform_5, window_bounds = array<i64: 32, 128>}]} {
    %c0 = arith.constant 0 : index
    %c0_0 = arith.constant 0 : index
    %0 = vector.load %arg1[%c0, %c0_0] : memref<32x256xf32, #tpu.memory_space<vmem>>, vector<32x256xf32>
    %1 = arith.truncf %0 : vector<32x256xf32> to vector<32x256xbf16>
    %c0_1 = arith.constant 0 : index
    %c0_2 = arith.constant 0 : index
    %2 = vector.load %arg4[%c0_1, %c0_2] : memref<2x256xf32, #tpu.memory_space<vmem>>, vector<2x256xf32>
    %c0_3 = arith.constant 0 : index
    %c0_4 = arith.constant 0 : index
    %3 = vector.load %arg2[%c0_3, %c0_4] : memref<256x256xbf16, #tpu.memory_space<vmem>>, vector<256x256xbf16>
    %cst = arith.constant dense<0.000000e+00> : vector<32x256xf32>
    %4 = tpu.matmul %1, %3, %cst {dimension_numbers = #tpu.dot_dimension_numbers<[1], [0], [0], [1], [0, 0, 1, 1], [], []>} : vector<32x256xbf16>, vector<256x256xbf16>, vector<32x256xf32> -> vector<32x256xf32>
    %5 = vector.extract_strided_slice %2 {offsets = [0, 0], sizes = [1, 256], strides = [1, 1]} : vector<2x256xf32> to vector<1x256xf32>
    %6 = vector.broadcast %5 : vector<1x256xf32> to vector<32x256xf32>
    %7 = arith.addf %4, %6 : vector<32x256xf32>
    %cst_5 = arith.constant 0.000000e+00 : f32
    %8 = vector.broadcast %cst_5 : f32 to vector<32x256xf32>
    %9 = arith.maximumf %7, %8 : vector<32x256xf32>
    %10 = arith.truncf %9 : vector<32x256xf32> to vector<32x256xbf16>
    %c0_6 = arith.constant 0 : index
    %c0_7 = arith.constant 0 : index
    %11 = vector.load %arg3[%c0_6, %c0_7] : memref<256x256xbf16, #tpu.memory_space<vmem>>, vector<256x256xbf16>
    %cst_8 = arith.constant dense<0.000000e+00> : vector<32x256xf32>
    %12 = tpu.matmul %10, %11, %cst_8 {dimension_numbers = #tpu.dot_dimension_numbers<[1], [0], [0], [1], [0, 0, 1, 1], [], []>} : vector<32x256xbf16>, vector<256x256xbf16>, vector<32x256xf32> -> vector<32x256xf32>
    %13 = vector.extract_strided_slice %2 {offsets = [1, 0], sizes = [1, 256], strides = [1, 1]} : vector<2x256xf32> to vector<1x256xf32>
    %14 = vector.broadcast %13 : vector<1x256xf32> to vector<32x256xf32>
    %15 = arith.addf %12, %14 : vector<32x256xf32>
    %cst_9 = arith.constant 0.000000e+00 : f32
    %16 = vector.broadcast %cst_9 : f32 to vector<32x256xf32>
    %17 = arith.maximumf %15, %16 : vector<32x256xf32>
    %18 = arith.truncf %17 : vector<32x256xf32> to vector<32x256xbf16>
    %c0_10 = arith.constant 0 : index
    %c0_11 = arith.constant 0 : index
    %19 = vector.load %arg5[%c0_10, %c0_11] : memref<256x128xbf16, #tpu.memory_space<vmem>>, vector<256x128xbf16>
    %cst_12 = arith.constant dense<0.000000e+00> : vector<32x128xf32>
    %20 = tpu.matmul %18, %19, %cst_12 {dimension_numbers = #tpu.dot_dimension_numbers<[1], [0], [0], [1], [0, 0, 1, 1], [], []>} : vector<32x256xbf16>, vector<256x128xbf16>, vector<32x128xf32> -> vector<32x128xf32>
    %c0_13 = arith.constant 0 : index
    %c0_14 = arith.constant 0 : index
    %21 = vector.load %arg6[%c0_13, %c0_14] : memref<32x128xf32, #tpu.memory_space<vmem>>, vector<32x128xf32>
    tpu.vector_store %arg6[%c0_13, %c0_14], %20 {strides = array<i32>} : memref<32x128xf32, #tpu.memory_space<vmem>>, vector<32x128xf32>,
    return
  }
  func.func @transform_0(%arg0: i32) -> (i32, i32) {
    %c0_i32 = arith.constant 0 : i32
    %c0_i32_0 = arith.constant 0 : i32
    return %arg0, %c0_i32 : i32, i32
  }
  func.func @transform_1(%arg0: i32) -> (i32, i32) {
    %c0_i32 = arith.constant 0 : i32
    %c0_i32_0 = arith.constant 0 : i32
    %c0_i32_1 = arith.constant 0 : i32
    return %c0_i32, %c0_i32_0 : i32, i32
  }
  func.func @transform_2(%arg0: i32) -> (i32, i32) {
    %c0_i32 = arith.constant 0 : i32
    %c0_i32_0 = arith.constant 0 : i32
    %c0_i32_1 = arith.constant 0 : i32
    return %c0_i32, %c0_i32_0 : i32, i32
  }
  func.func @transform_3(%arg0: i32) -> (i32, i32) {
    %c0_i32 = arith.constant 0 : i32
    %c0_i32_0 = arith.constant 0 : i32
    %c0_i32_1 = arith.constant 0 : i32
    return %c0_i32, %c0_i32_0 : i32, i32
  }
  func.func @transform_4(%arg0: i32) -> (i32, i32) {
    %c0_i32 = arith.constant 0 : i32
    %c0_i32_0 = arith.constant 0 : i32
    %c0_i32_1 = arith.constant 0 : i32
    return %c0_i32, %c0_i32_0 : i32, i32
  }
  func.func @transform_5(%arg0: i32) -> (i32, i32) {
    %c0_i32 = arith.constant 0 : i32
    %c0_i32_0 = arith.constant 0 : i32
    return %arg0, %c0_i32 : i32, i32
  }
}

</mosaic_0001>

<bundles_post_ra>
// kernel: tpu_custom_call.1
= control target key start
LH: loop header
LB: loop body
LE: loop exit
PB: predicated region body
PF: predicated region fallthrough
CT: control target
= control target key end

     0   :  { %10 = vsyncpa [#allocation3], 0  ;;  %s1338_s0 = inlined_call_operand.hbm [shape: f32[32,256], index: 0, kind: input, shape index: {}]   ;;  %s1339_s1 = inlined_call_operand.hbm [shape: bf16[256,256], index: 1, kind: input, shape index: {}]   ;;  %s1340_s2 = inlined_call_operand.hbm [shape: bf16[256,256], index: 2, kind: input, shape index: {}]   ;;  %s1341_s3 = inlined_call_operand.vmem [shape: f32[2,256], index: 3, kind: input, shape index: {}]   ;;  %s1342_s4 = inlined_call_operand.hbm [shape: bf16[256,128], index: 4, kind: input, shape index: {}]   ;;  %s1343_s5 = inlined_call_operand.hbm [shape: f32[32,128], index: 5, kind: output, shape index: {}]  }
   0x1   :  { %11 = vsyncpa [#allocation6], 0 }
   0x2   :  { %12 = vsyncpa [#allocation9], 0 }
   0x3   :  { %13 = vsyncpa [#allocation4], 0  ;;  %s1206_s18 = smov [#allocation5]   ;;  %s1088_s22 = scalar_lea.hbm %s1339_s1, 4096 }
   0x4   :  { %s31_s19 = sshll.u32 %s1206_s18, 4  ;;  %p1089_p0 = scmp.ne.s32.totalorder %s1339_s1, %s1088_s22  ;;  %s32_s19 = int_to_ptr.vmem [resolvable:$true] %s31_s19 }
   0x5   :  { %p1092_p1 = scmp.lt.u32.totalorder %s1088_s22, %s1339_s1 }
   0x7   :  { %p1094_p2 = pnand %p1092_p1, %p1089_p0 }
   0x9   :  { %1097 = shalt.err (!%p1094_p2)
}
   0xa   :  { %s1098_s27 = scalar_lea.vmem %s32_s19, 4096  ;;  %p1103_p4 = scmp.lt.s32.totalorder %s32_s19, %s32_s19 }
   0xb   :  { %p1099_p3 = scmp.ne.s32.totalorder %s32_s19, %s1098_s27  ;;  %p1104_p5 = scmp.lt.s32.totalorder %s1098_s27, %s1098_s27 }
   0xd   :  { %p1105_p6 = por %p1104_p5, %p1103_p4 }
   0xf   :  { %p1106_p7 = pnand %p1105_p6, %p1099_p3 }
  0x11   :  { %1109 = shalt.err (!%p1106_p7)
}
  0x12   :  { %s1207_s28 = smov 128   ;;  %s1208_s29 = smov 8  }
  0x13   :  { %37 = dma.hbm_to_vmem [thread:$0]  %s1339_s1, 4096, %s32_s19, [#allocation6], %s1207_s28, %s1207_s28, %s1208_s29  }
  0x14   :  { %s1209_s7 = smov [#allocation2]   ;;  %s1110_s11 = scalar_lea.hbm %s1338_s0, 1024 }
  0x15   :  { %s19_s8 = sshll.u32 %s1209_s7, 4  ;;  %p1111_p8 = scmp.ne.s32.totalorder %s1338_s0, %s1110_s11  ;;  %s20_s8 = int_to_ptr.vmem [resolvable:$true] %s19_s8 }
  0x16   :  { %p1114_p9 = scmp.lt.u32.totalorder %s1110_s11, %s1338_s0 }
  0x18   :  { %p1116_p10 = pnand %p1114_p9, %p1111_p8 }
  0x1a   :  { %1119 = shalt.err (!%p1116_p10)
}
  0x1b   :  { %s1120_s16 = scalar_lea.vmem %s20_s8, 1024  ;;  %p1125_p12 = scmp.lt.s32.totalorder %s20_s8, %s20_s8 }
  0x1c   :  { %p1121_p11 = scmp.ne.s32.totalorder %s20_s8, %s1120_s16  ;;  %p1126_p13 = scmp.lt.s32.totalorder %s1120_s16, %s1120_s16 }
  0x1e   :  { %p1127_p0 = por %p1126_p13, %p1125_p12 }
  0x20   :  { %p1128_p1 = pnand %p1127_p0, %p1121_p11 }
  0x22   :  { %1131 = shalt.err (!%p1128_p1)
}
  0x23   :  { %s1210_s1 = smov 256   ;;  %s1211_s17 = smov 16  }
  0x24   :  { %25 = dma.hbm_to_vmem [thread:$0]  %s1338_s0, 1024, %s20_s8, [#allocation3], %s1210_s1, %s1210_s1, %s1211_s17  }
  0x25   :  { %s1212_s20 = smov [#allocation7]   ;;  %s1213_s22 = smov [#allocation8]  }
  0x26   :  { %s43_s21 = sshll.u32 %s1212_s20, 4  ;;  %s57_s23 = sshll.u32 %s1213_s22, 4  ;;  %s44_s21 = int_to_ptr.vmem [resolvable:$true] %s43_s21  ;;  %s1274_s23 = int_to_ptr.vmem [resolvable:$true] %s57_s23 }
  0x27   :  { %s1132_s26 = scalar_lea.hbm %s1340_s2, 4096 }
  0x28   :  { %p1133_p2 = scmp.ne.s32.totalorder %s1340_s2, %s1132_s26  ;;  %p1136_p3 = scmp.lt.u32.totalorder %s1132_s26, %s1340_s2 }
  0x2a   :  { %p1138_p4 = pnand %p1136_p3, %p1133_p2 }
  0x2c   :  { %1141 = shalt.err (!%p1138_p4)
}
  0x2d   :  { %s1142_s0 = scalar_lea.vmem %s44_s21, 4096  ;;  %p1147_p6 = scmp.lt.s32.totalorder %s44_s21, %s44_s21 }
  0x2e   :  { %p1143_p5 = scmp.ne.s32.totalorder %s44_s21, %s1142_s0  ;;  %p1148_p7 = scmp.lt.s32.totalorder %s1142_s0, %s1142_s0 }
  0x30   :  { %p1149_p8 = por %p1148_p7, %p1147_p6 }
  0x32   :  { %p1150_p9 = pnand %p1149_p8, %p1143_p5 }
  0x34   :  { %1153 = shalt.err (!%p1150_p9)
}
  0x35   :  { %49 = dma.hbm_to_vmem [thread:$0]  %s1340_s2, 4096, %s44_s21, [#allocation6], %s1207_s28, %s1207_s28, %s1208_s29  }
  0x36   :  { %s1154_s12 = scalar_lea.hbm %s1342_s4, 2048 }
  0x37   :  { %p1155_p10 = scmp.ne.s32.totalorder %s1342_s4, %s1154_s12  ;;  %p1158_p11 = scmp.lt.u32.totalorder %s1154_s12, %s1342_s4 }
  0x39   :  { %p1160_p12 = pnand %p1158_p11, %p1155_p10 }
  0x3b   :  { %1163 = shalt.err (!%p1160_p12)
}
  0x3c   :  { %s1164_s1 = scalar_lea.vmem %s1274_s23, 2048  ;;  %p1169_p0 = scmp.lt.s32.totalorder %s1274_s23, %s1274_s23 }
  0x3d   :  { %p1165_p13 = scmp.ne.s32.totalorder %s1274_s23, %s1164_s1  ;;  %p1170_p1 = scmp.lt.s32.totalorder %s1164_s1, %s1164_s1 }
  0x3f   :  { %p1171_p2 = por %p1170_p1, %p1169_p0 }
  0x41   :  { %p1172_p3 = pnand %p1171_p2, %p1165_p13 }
  0x43   :  { %1175 = shalt.err (!%p1172_p3)
}
  0x44   :  { %s1214_s2 = smov 64   ;;  %s1215_s17 = smov 4  }
  0x45   :  { %63 = dma.hbm_to_vmem [thread:$0]  %s1342_s4, 2048, %s1274_s23, [#allocation9], %s1214_s2, %s1214_s2, %s1215_s17  }
  0x46   :  { %1198 = dma.done.wait [#allocation3], 1024  }
  0x47   :  { %1199 = vsyncadd [#allocation3], 4294966272 }
  0x48   :  { %1200 = dma.done.wait [#allocation6], 8192  }
  0x49   :  { %1201 = vsyncadd [#allocation6], 4294959104 }
  0x4a   :  { %1202 = dma.done.wait [#allocation9], 2048  }
  0x4b   :  { %1203 = vsyncadd [#allocation9], 4294965248  ;;  %v976_v0 = vld [vmem:[#allocation5 + $0x4] ss:$8 sps:$4 sm:$0xff]   ;;  %v978_v1 = vld [vmem:[#allocation5] ss:$8 sps:$4 sm:$0xff]  }
  0x4c   :  { %301 = vmatprep.subr.bf16.mxu0 %v976_v0  ;;  %v979_v2 = vld [vmem:[#allocation5 + $0x14] ss:$8 sps:$4 sm:$0xff]   ;;  %v981_v3 = vld [vmem:[#allocation5 + $0x10] ss:$8 sps:$4 sm:$0xff]   ;;  %v982_v4 = vld [vmem:[#allocation5 + $0x24] ss:$8 sps:$4 sm:$0xff]  }
  0x4d   :  { %302 = vmatpush1.bf16.msra.mxu0 %v978_v1  ;;  %v984_v5 = vld [vmem:[#allocation5 + $0x20] ss:$8 sps:$4 sm:$0xff]   ;;  %v985_v6 = vld [vmem:[#allocation5 + $0x34] ss:$8 sps:$4 sm:$0xff]   ;;  %v987_v7 = vld [vmem:[#allocation5 + $0x30] ss:$8 sps:$4 sm:$0xff]  }
  0x4e   :  { %303 = vmatprep.subr.bf16.mxu0 %v979_v2  ;;  %v988_v8 = vld [vmem:[#allocation5 + $0x44] ss:$8 sps:$4 sm:$0xff]   ;;  %v990_v9 = vld [vmem:[#allocation5 + $0x40] ss:$8 sps:$4 sm:$0xff]   ;;  %v991_v10 = vld [vmem:[#allocation5 + $0x54] ss:$8 sps:$4 sm:$0xff]  }
  0x4f   :  { %v993_v11 = vld [vmem:[#allocation5 + $0x50] ss:$8 sps:$4 sm:$0xff]   ;;  %v994_v12 = vld [vmem:[#allocation5 + $0x64] ss:$8 sps:$4 sm:$0xff]   ;;  %v996_v16 = vld [vmem:[#allocation5 + $0x60] ss:$8 sps:$4 sm:$0xff]  }
  0x50   :  { %v78_v13 = vld [vmem:[#allocation2 + $0x8] sm:$0xff]  ;;  %v80_v14 = vld [vmem:[#allocation2 + $0x18] sm:$0xff]  ;;  %v77_v54 = vld [vmem:[#allocation2] sm:$0xff] }
  0x51   :  { %304 = vmatpush1.bf16.msra.mxu0 %v981_v3  ;;  %v86_v15 = vpack.c.bf16 %v80_v14, %v78_v13  ;;  %v997_v17 = vld [vmem:[#allocation5 + $0x74] ss:$8 sps:$4 sm:$0xff]   ;;  %v1024_v18 = vld [vmem:[#allocation7 + $0x4] ss:$8 sps:$4 sm:$0xff]   ;;  %v1026_v19 = vld [vmem:[#allocation7] ss:$8 sps:$4 sm:$0xff]  }
  0x52   :  { %305 = vmatprep.subr.bf16.mxu0 %v982_v4  ;;  %v999_v20 = vld [vmem:[#allocation5 + $0x70] ss:$8 sps:$4 sm:$0xff]   ;;  %576 = vmatprep.subr.bf16.mxu1 %v1024_v18  ;;  %v1027_v21 = vld [vmem:[#allocation7 + $0x14] ss:$8 sps:$4 sm:$0xff]   ;;  %v1000_v22 = vld [vmem:[#allocation5 + $0x84] ss:$8 sps:$4 sm:$0xff]  }
  0x53   :  { %333 = vmatprep.mubr.bf16.mxu0 %v86_v15  ;;  %577 = vmatpush1.bf16.msra.mxu1 %v1026_v19  ;;  %v1029_v23 = vld [vmem:[#allocation7 + $0x10] ss:$8 sps:$4 sm:$0xff]   ;;  %v1030_v24 = vld [vmem:[#allocation7 + $0x24] ss:$8 sps:$4 sm:$0xff]   ;;  %v1002_v25 = vld [vmem:[#allocation5 + $0x80] ss:$8 sps:$4 sm:$0xff]  }
  0x54   :  { %578 = vmatprep.subr.bf16.mxu1 %v1027_v21  ;;  %v1003_v26 = vld [vmem:[#allocation5 + $0x94] ss:$8 sps:$4 sm:$0xff]   ;;  %v1032_v27 = vld [vmem:[#allocation7 + $0x20] ss:$8 sps:$4 sm:$0xff]   ;;  %v1005_v29 = vld [vmem:[#allocation5 + $0x90] ss:$8 sps:$4 sm:$0xff]  }
  0x55   :  { %306 = vmatpush1.bf16.msra.mxu0 %v984_v5  ;;  %v1033_v28 = vld [vmem:[#allocation7 + $0x34] ss:$8 sps:$4 sm:$0xff]   ;;  %v1006_v30 = vld [vmem:[#allocation5 + $0xa4] ss:$8 sps:$4 sm:$0xff]   ;;  %v1035_v31 = vld [vmem:[#allocation7 + $0x30] ss:$8 sps:$4 sm:$0xff]  }
  0x56   :  { %307 = vmatprep.subr.bf16.mxu0 %v985_v6  ;;  %v1036_v32 = vld [vmem:[#allocation7 + $0x44] ss:$8 sps:$4 sm:$0xff]   ;;  %v1008_v33 = vld [vmem:[#allocation5 + $0xa0] ss:$8 sps:$4 sm:$0xff]   ;;  %v1009_v34 = vld [vmem:[#allocation5 + $0xb4] ss:$8 sps:$4 sm:$0xff]  }
  0x57   :  { %579 = vmatpush1.bf16.msra.mxu1 %v1029_v23  ;;  %v1038_v35 = vld [vmem:[#allocation7 + $0x40] ss:$8 sps:$4 sm:$0xff]   ;;  %v1039_v36 = vld [vmem:[#allocation7 + $0x54] ss:$8 sps:$4 sm:$0xff]   ;;  %v1011_v37 = vld [vmem:[#allocation5 + $0xb0] ss:$8 sps:$4 sm:$0xff]   ;;  %v123_v23 = vlaneseq }
  0x58   :  { %580 = vmatprep.subr.bf16.mxu1 %v1030_v24  ;;  %v1012_v38 = vld [vmem:[#allocation5 + $0xc4] ss:$8 sps:$4 sm:$0xff]   ;;  %v1041_v39 = vld [vmem:[#allocation7 + $0x50] ss:$8 sps:$4 sm:$0xff]   ;;  %v1014_v41 = vld [vmem:[#allocation5 + $0xc0] ss:$8 sps:$4 sm:$0xff]  }
  0x59   :  { %308 = vmatpush1.bf16.msra.mxu0 %v987_v7  ;;  %v1042_v40 = vld [vmem:[#allocation7 + $0x64] ss:$8 sps:$4 sm:$0xff]   ;;  %v1044_v42 = vld [vmem:[#allocation7 + $0x60] ss:$8 sps:$4 sm:$0xff]   ;;  %v1015_v43 = vld [vmem:[#allocation5 + $0xd4] ss:$8 sps:$4 sm:$0xff]  }
  0x5a   :  { %309 = vmatprep.subr.bf16.mxu0 %v988_v8  ;;  %v1045_v44 = vld [vmem:[#allocation7 + $0x74] ss:$8 sps:$4 sm:$0xff]   ;;  %v1017_v45 = vld [vmem:[#allocation5 + $0xd0] ss:$8 sps:$4 sm:$0xff]   ;;  %v1018_v47 = vld [vmem:[#allocation5 + $0xe4] ss:$8 sps:$4 sm:$0xff]  }
  0x5b   :  { %581 = vmatpush1.bf16.msra.mxu1 %v1032_v27  ;;  %v1047_v46 = vld [vmem:[#allocation7 + $0x70] ss:$8 sps:$4 sm:$0xff]   ;;  %v1048_v48 = vld [vmem:[#allocation7 + $0x84] ss:$8 sps:$4 sm:$0xff]   ;;  %v1020_v49 = vld [vmem:[#allocation5 + $0xe0] ss:$8 sps:$4 sm:$0xff]  }
  0x5c   :  { %582 = vmatprep.subr.bf16.mxu1 %v1033_v28  ;;  %v1050_v50 = vld [vmem:[#allocation7 + $0x80] ss:$8 sps:$4 sm:$0xff]   ;;  %v1021_v51 = vld [vmem:[#allocation5 + $0xf4] ss:$8 sps:$4 sm:$0xff]   ;;  %v1023_v53 = vld [vmem:[#allocation5 + $0xf0] ss:$8 sps:$4 sm:$0xff]  }
  0x5d   :  { %310 = vmatpush1.bf16.msra.mxu0 %v990_v9  ;;  %v1051_v52 = vld [vmem:[#allocation7 + $0x94] ss:$8 sps:$4 sm:$0xff]   ;;  %v1053_v56 = vld [vmem:[#allocation7 + $0x90] ss:$8 sps:$4 sm:$0xff]   ;;  %v82_v57 = vld [vmem:[#allocation2 + $0x28] sm:$0xff]  ;;  %v1308_v24 = vshrl.u32 %v123_v23, 7 }
  0x5e   :  { %311 = vmatprep.subr.bf16.mxu0 %v991_v10  ;;  %v79_v55 = vld [vmem:[#allocation2 + $0x10] sm:$0xff]  ;;  %v84_v58 = vld [vmem:[#allocation2 + $0x38] sm:$0xff]  ;;  %v1054_v59 = vld [vmem:[#allocation7 + $0xa4] ss:$8 sps:$4 sm:$0xff]  }
  0x5f   :  { %583 = vmatpush1.bf16.msra.mxu1 %v1035_v31  ;;  %v85_v60 = vpack.c.bf16 %v79_v55, %v77_v54  ;;  %v88_v61 = vpack.c.bf16 %v84_v58, %v82_v57  ;;  %v1056_v62 = vld [vmem:[#allocation7 + $0xa0] ss:$8 sps:$4 sm:$0xff]   ;;  %v1057_v63 = vld [vmem:[#allocation7 + $0xb4] ss:$8 sps:$4 sm:$0xff]   ;;  %v1059_v2 = vld [vmem:[#allocation7 + $0xb0] ss:$8 sps:$4 sm:$0xff]  }
  0x60   :  { %584 = vmatprep.subr.bf16.mxu1 %v1036_v32  ;;  %v81_v0 = vld [vmem:[#allocation2 + $0x20] sm:$0xff]  ;;  %v83_v1 = vld [vmem:[#allocation2 + $0x30] sm:$0xff]  ;;  %v1074_v14 = vld [vmem:[#allocation8 + $0x48] sm:$0xff]   ;;  %v129_v27 = vsub.s32 2, %v1308_v24 }
  0x61   :  { %312 = vmatpush1.bf16.msra.mxu0 %v993_v11  ;;  %v1060_v3 = vld [vmem:[#allocation7 + $0xc4] ss:$8 sps:$4 sm:$0xff]   ;;  %v87_v4 = vpack.c.bf16 %v83_v1, %v81_v0  ;;  %v1062_v5 = vld [vmem:[#allocation7 + $0xc0] ss:$8 sps:$4 sm:$0xff]   ;;  %v1063_v6 = vld [vmem:[#allocation7 + $0xd4] ss:$8 sps:$4 sm:$0xff]  }
  0x62   :  { %313 = vmatprep.subr.bf16.mxu0 %v994_v12  ;;  %v1065_v7 = vld [vmem:[#allocation7 + $0xd0] ss:$8 sps:$4 sm:$0xff]   ;;  %v1066_v8 = vld [vmem:[#allocation7 + $0xe4] ss:$8 sps:$4 sm:$0xff]   ;;  %v1068_v9 = vld [vmem:[#allocation7 + $0xe0] ss:$8 sps:$4 sm:$0xff]  }
  0x63   :  { %585 = vmatpush1.bf16.msra.mxu1 %v1038_v35  ;;  %v1069_v10 = vld [vmem:[#allocation7 + $0xf4] ss:$8 sps:$4 sm:$0xff]   ;;  %v1071_v11 = vld [vmem:[#allocation7 + $0xf0] ss:$8 sps:$4 sm:$0xff]   ;;  %v1072_v12 = vld [vmem:[#allocation8 + $0x40] sm:$0xff]   ;;  %v400_v1 = vsub.s32 1, %v1308_v24 }
  0x64   :  { %586 = vmatprep.subr.bf16.mxu1 %v1039_v36  ;;  %v1073_v13 = vld [vmem:[#allocation8] sm:$0xff]   ;;  %v1075_v15 = vld [vmem:[#allocation8 + $0x8] sm:$0xff]   ;;  %v1078_v18 = vld [vmem:[#allocation8 + $0x58] sm:$0xff]  }
  0x65   :  { %314 = vmatpush1.bf16.msra.mxu0 %v996_v16  ;;  %v1076_v16 = vld [vmem:[#allocation8 + $0x50] sm:$0xff]   ;;  %v1079_v19 = vld [vmem:[#allocation8 + $0x18] sm:$0xff]   ;;  %v1081_v21 = vld [vmem:[#allocation8 + $0x20] sm:$0xff]  }
  0x66   :  { %315 = vmatprep.subr.bf16.mxu0 %v997_v17  ;;  %v1077_v17 = vld [vmem:[#allocation8 + $0x10] sm:$0xff]   ;;  %v1087_v0 = vld [vmem:[#allocation8 + $0x38] sm:$0xff]  }
  0x67   :  { %587 = vmatpush1.bf16.msra.mxu1 %v1041_v39 }
  0x68   :  { %588 = vmatprep.subr.bf16.mxu1 %v1042_v40 }
  0x69   :  { %316 = vmatpush1.bf16.msra.mxu0 %v999_v20  ;;  %v1080_v20 = vld [vmem:[#allocation8 + $0x60] sm:$0xff]  }
  0x6a   :  { %317 = vmatprep.subr.bf16.mxu0 %v1000_v22  ;;  %v1082_v22 = vld [vmem:[#allocation8 + $0x68] sm:$0xff]  }
  0x6b   :  { %589 = vmatpush1.bf16.msra.mxu1 %v1044_v42 }
  0x6c   :  { %590 = vmatprep.subr.bf16.mxu1 %v1045_v44 }
  0x6d   :  { %318 = vmatpush1.bf16.msra.mxu0 %v1002_v25  ;;  %v125_v25 = vsub.s32 0, %v1308_v24 }
  0x6e   :  { %319 = vmatprep.subr.bf16.mxu0 %v1003_v26  ;;  %v1314_v26 = vld [vmem:[%s1341_s3] sm:$0xf]  ;;  %s1216_s3 = smov [#allocation10]  }
  0x6f   :  { %591 = vmatpush1.bf16.msra.mxu1 %v1047_v46  ;;  %v126_v28 = vrot.slane %v1314_v26, %v125_v25  ;;  %s827_s21 = sshll.u32 %s1216_s3, 4  ;;  %s828_s21 = int_to_ptr.vmem [resolvable:$true] %s827_s21 }
  0x70   :  { %592 = vmatprep.subr.bf16.mxu1 %v1048_v48  ;;  %s1176_s22 = scalar_lea.vmem %s828_s21, 512  ;;  %p1181_p5 = scmp.lt.s32.totalorder %s828_s21, %s828_s21 }
  0x71   :  { %320 = vmatpush1.bf16.msra.mxu0 %v1005_v29  ;;  %v130_v29 = vrot.slane %v1314_v26, %v129_v27  ;;  %p1177_p4 = scmp.ne.s32.totalorder %s828_s21, %s1176_s22  ;;  %p1182_p6 = scmp.lt.s32.totalorder %s1176_s22, %s1176_s22 }
  0x72   :  { %321 = vmatprep.subr.bf16.mxu0 %v1006_v30  ;;  %v136_v30 = vrot.slane %v126_v28, %v125_v25 }
  0x73   :  { %593 = vmatpush1.bf16.msra.mxu1 %v1050_v50  ;;  %v140_v31 = vrot.slane %v130_v29, %v125_v25  ;;  %p1183_p7 = por %p1182_p6, %p1181_p5 }
  0x74   :  { %594 = vmatprep.subr.bf16.mxu1 %v1051_v52 }
  0x75   :  { %322 = vmatpush1.bf16.msra.mxu0 %v1008_v33  ;;  %p1184_p8 = pnand %p1183_p7, %p1177_p4 }
  0x76   :  { %323 = vmatprep.subr.bf16.mxu0 %v1009_v34 }
  0x77   :  { %595 = vmatpush1.bf16.msra.mxu1 %v1053_v56 }
  0x78   :  { %596 = vmatprep.subr.bf16.mxu1 %v1054_v59 }
  0x79   :  { %324 = vmatpush1.bf16.msra.mxu0 %v1011_v37 }
  0x7a   :  { %325 = vmatprep.subr.bf16.mxu0 %v1012_v38 }
  0x7b   :  { %597 = vmatpush1.bf16.msra.mxu1 %v1056_v62  ;;  %v1085_v62 = vld [vmem:[#allocation8 + $0x30] sm:$0xff]  }
  0x7c   :  { %598 = vmatprep.subr.bf16.mxu1 %v1057_v63  ;;  %v1086_v63 = vld [vmem:[#allocation8 + $0x78] sm:$0xff]  }
  0x7d   :  { %326 = vmatpush1.bf16.msra.mxu0 %v1014_v41 }
  0x7e   :  { %327 = vmatprep.subr.bf16.mxu0 %v1015_v43 }
  0x7f   :  { %599 = vmatpush1.bf16.msra.mxu1 %v1059_v2  ;;  %v404_v2 = vsub.s32 3, %v1308_v24 }
  0x80   :  { %600 = vmatprep.subr.bf16.mxu1 %v1060_v3  ;;  %v401_v3 = vrot.slane %v1314_v26, %v400_v1 }
  0x81   :  { %328 = vmatpush1.bf16.msra.mxu0 %v1017_v45 }
  0x82   :  { %329 = vmatprep.subr.bf16.mxu0 %v1018_v47 }
  0x83   :  { %601 = vmatpush1.bf16.msra.mxu1 %v1062_v5  ;;  %v411_v5 = vrot.slane %v401_v3, %v400_v1 }
  0x84   :  { %602 = vmatprep.subr.bf16.mxu1 %v1063_v6 }
  0x85   :  { %330 = vmatpush1.bf16.msra.mxu0 %v1020_v49 }
  0x86   :  { %331 = vmatprep.subr.bf16.mxu0 %v1021_v51 }
  0x87   :  { %603 = vmatpush1.bf16.msra.mxu1 %v1065_v7 }
  0x88   :  { %604 = vmatprep.subr.bf16.mxu1 %v1066_v8 }
  0x89   :  { %332 = vmatpush1.bf16.msra.mxu0 %v1023_v53 }
  0x8a   :  { %921 = vmatprep.subr.bf16.mxu0 %v1072_v12 }
  0x8b   :  { %605 = vmatpush1.bf16.msra.mxu1 %v1068_v9 }
  0x8c   :  { %334 = vmatmul.mubr.bf16.vlgmr.msra.gmra.mrb[0].mxu0 %v85_v60  ;;  %606 = vmatprep.subr.bf16.mxu1 %v1069_v10  ;;  %v1083_v60 = vld [vmem:[#allocation8 + $0x28] sm:$0xff]  }
  0x8d   :  { %343 = vmatprep.mubr.bf16.mxu0 %v88_v61  ;;  %922 = vmatpush3.bf16.msra.mxu0 %v1073_v13  ;;  %v1084_v61 = vld [vmem:[#allocation8 + $0x70] sm:$0xff]  }
  0x8e   :  { %923 = vmatprep.subr.bf16.mxu0 %v1074_v14 }
  0x8f   :  { %607 = vmatpush1.bf16.msra.mxu1 %v1071_v11 }
  0x90   :  { %949 = vmatprep.subr.bf16.mxu1 %v1072_v12 }
  0x91   :  { %924 = vmatpush3.bf16.msra.mxu0 %v1075_v15 }
  0x92   :  { %925 = vmatprep.subr.bf16.mxu0 %v1076_v16 }
  0x94   :  { %344 = vmatmul.mubr.bf16.gmra.mrb[4].mxu0 %v87_v4  ;;  %v405_v4 = vrot.slane %v1314_v26, %v404_v2 }
  0x95   :  { %926 = vmatpush3.bf16.msra.mxu0 %v1077_v17 }
  0x96   :  { %927 = vmatprep.subr.bf16.mxu0 %v1078_v18  ;;  %v415_v6 = vrot.slane %v405_v4, %v400_v1 }
  0x99   :  { %928 = vmatpush3.bf16.msra.mxu0 %v1079_v19 }
  0x9a   :  { %929 = vmatprep.subr.bf16.mxu0 %v1080_v20 }
  0x9d   :  { %930 = vmatpush3.bf16.msra.mxu0 %v1081_v21 }
  0x9e   :  { %931 = vmatprep.subr.bf16.mxu0 %v1082_v22 }
  0xa1   :  { %932 = vmatpush3.bf16.msra.mxu0 %v1083_v60 }
  0xa2   :  { %933 = vmatprep.subr.bf16.mxu0 %v1084_v61 }
  0xa5   :  { %934 = vmatpush3.bf16.msra.mxu0 %v1085_v62 }
  0xa6   :  { %935 = vmatprep.subr.bf16.mxu0 %v1086_v63 }
  0xa9   :  { %936 = vmatpush3.bf16.msra.mxu0 %v1087_v0 }
 0x15f   :  { %v335_v32 = vpop.f32.mrb[0].mxu0 }
 0x160   :  { %v336_v33 = vadd.f32 %v335_v32, %v136_v30  ;;  %v337_v34 = vpop.f32.mrb[1].mxu0 }
 0x161   :  { %v338_v35 = vadd.f32 %v337_v34, %v140_v31  ;;  %v339_v36 = vpop.f32.mrb[2].mxu0 }
 0x162   :  { %v340_v37 = vadd.f32 %v339_v36, %v136_v30  ;;  %v341_v38 = vpop.f32.mrb[3].mxu0  ;;  %v354_v40 = vmax.f32 %v336_v33, 0.0 }
 0x163   :  { %v342_v39 = vadd.f32 %v341_v38, %v140_v31  ;;  %v355_v42 = vmax.f32 %v338_v35, 0.0 }
 0x164   :  { %v356_v41 = vmax.f32 %v340_v37, 0.0 }
 0x165   :  { %v357_v43 = vmax.f32 %v342_v39, 0.0 }
 0x166   :  { %v362_v44 = vpack.c.bf16 %v356_v41, %v354_v40 }
 0x167   :  { %v345_v45 = vpop.f32.mrb[4].mxu0  ;;  %v363_v46 = vpack.c.bf16 %v357_v43, %v355_v42 }
 0x168   :  { %v346_v47 = vadd.f32 %v345_v45, %v136_v30  ;;  %v347_v48 = vpop.f32.mrb[5].mxu0 }
 0x169   :  { %v348_v49 = vadd.f32 %v347_v48, %v140_v31  ;;  %v349_v50 = vpop.f32.mrb[6].mxu0  ;;  %608 = vmatprep.mubr.bf16.mxu1 %v363_v46 }
 0x16a   :  { %v350_v51 = vadd.f32 %v349_v50, %v136_v30  ;;  %v351_v52 = vpop.f32.mrb[7].mxu0  ;;  %609 = vmatmul.mubr.bf16.vlgmr.msra.gmra.mrb[0].mxu1 %v362_v44  ;;  %v358_v54 = vmax.f32 %v346_v47, 0.0 }
 0x16b   :  { %v352_v53 = vadd.f32 %v351_v52, %v140_v31  ;;  %957 = vmatpush3.bf16.msra.mxu1 %v1073_v13  ;;  %v359_v56 = vmax.f32 %v348_v49, 0.0 }
 0x16c   :  { %v360_v55 = vmax.f32 %v350_v51, 0.0  ;;  %950 = vmatprep.subr.bf16.mxu1 %v1074_v14 }
 0x16d   :  { %v361_v57 = vmax.f32 %v352_v53, 0.0 }
 0x16e   :  { %v364_v58 = vpack.c.bf16 %v360_v55, %v358_v54 }
 0x16f   :  { %v365_v59 = vpack.c.bf16 %v361_v57, %v359_v56  ;;  %958 = vmatpush3.bf16.msra.mxu1 %v1075_v15 }
 0x170   :  { %951 = vmatprep.subr.bf16.mxu1 %v1076_v16 }
 0x171   :  { %618 = vmatprep.mubr.bf16.mxu1 %v365_v59 }
 0x172   :  { %619 = vmatmul.mubr.bf16.gmra.mrb[4].mxu1 %v364_v58 }
 0x173   :  { %959 = vmatpush3.bf16.msra.mxu1 %v1077_v17 }
 0x174   :  { %952 = vmatprep.subr.bf16.mxu1 %v1078_v18 }
 0x177   :  { %960 = vmatpush3.bf16.msra.mxu1 %v1079_v19 }
 0x178   :  { %953 = vmatprep.subr.bf16.mxu1 %v1080_v20 }
 0x17b   :  { %961 = vmatpush3.bf16.msra.mxu1 %v1081_v21 }
 0x17c   :  { %954 = vmatprep.subr.bf16.mxu1 %v1082_v22 }
 0x17f   :  { %962 = vmatpush3.bf16.msra.mxu1 %v1083_v60 }
 0x180   :  { %955 = vmatprep.subr.bf16.mxu1 %v1084_v61 }
 0x183   :  { %963 = vmatpush3.bf16.msra.mxu1 %v1085_v62 }
 0x184   :  { %956 = vmatprep.subr.bf16.mxu1 %v1086_v63 }
 0x187   :  { %964 = vmatpush3.bf16.msra.mxu1 %v1087_v0 }
 0x23d   :  { %v610_v7 = vpop.f32.mrb[0].mxu1 }
 0x23e   :  { %v611_v8 = vadd.f32 %v610_v7, %v411_v5  ;;  %v612_v9 = vpop.f32.mrb[1].mxu1 }
 0x23f   :  { %v613_v10 = vadd.f32 %v612_v9, %v415_v6  ;;  %v614_v11 = vpop.f32.mrb[2].mxu1 }
 0x240   :  { %v615_v12 = vadd.f32 %v614_v11, %v411_v5  ;;  %v616_v13 = vpop.f32.mrb[3].mxu1  ;;  %v629_v15 = vmax.f32 %v611_v8, 0.0 }
 0x241   :  { %v617_v14 = vadd.f32 %v616_v13, %v415_v6  ;;  %v630_v17 = vmax.f32 %v613_v10, 0.0 }
 0x242   :  { %v631_v16 = vmax.f32 %v615_v12, 0.0 }
 0x243   :  { %v632_v18 = vmax.f32 %v617_v14, 0.0 }
 0x244   :  { %v637_v19 = vpack.c.bf16 %v631_v16, %v629_v15 }
 0x245   :  { %v638_v20 = vpack.c.bf16 %v632_v18, %v630_v17  ;;  %v620_v21 = vpop.f32.mrb[4].mxu1 }
 0x246   :  { %v621_v22 = vadd.f32 %v620_v21, %v411_v5  ;;  %v622_v23 = vpop.f32.mrb[5].mxu1 }
 0x247   :  { %v623_v24 = vadd.f32 %v622_v23, %v415_v6  ;;  %v624_v25 = vpop.f32.mrb[6].mxu1  ;;  %801 = vmatprep.mubr.bf16.mxu0 %v638_v20 }
 0x248   :  { %v625_v26 = vadd.f32 %v624_v25, %v411_v5  ;;  %v626_v27 = vpop.f32.mrb[7].mxu1  ;;  %802 = vmatmul.mubr.bf16.vlgmr.msra.gmra.mrb[8].mxu0 %v637_v19  ;;  %v633_v29 = vmax.f32 %v621_v22, 0.0 }
 0x249   :  { %v627_v28 = vadd.f32 %v626_v27, %v415_v6  ;;  %v634_v31 = vmax.f32 %v623_v24, 0.0 }
 0x24a   :  { %v635_v30 = vmax.f32 %v625_v26, 0.0 }
 0x24b   :  { %v636_v32 = vmax.f32 %v627_v28, 0.0 }
 0x24c   :  { %v639_v33 = vpack.c.bf16 %v635_v30, %v633_v29 }
 0x24d   :  { %v640_v34 = vpack.c.bf16 %v636_v32, %v634_v31 }
 0x24f   :  { %809 = vmatprep.mubr.bf16.mxu1 %v640_v34 }
 0x250   :  { %810 = vmatmul.mubr.bf16.vlgmr.msra.gmra.mrb[8].mxu1 %v639_v33 }
 0x31b   :  { %v937_v35 = vpop.f32.mrb[8].mxu0 }
 0x31c   :  { %v938_v36 = vpop.f32.mrb[9].mxu0 }
 0x31d   :  { %v939_v37 = vadd.f32 %v938_v36, %v937_v35  ;;  %v940_v38 = vpop.f32.mrb[10].mxu0 }
 0x31e   :  { %v941_v39 = vpop.f32.mrb[11].mxu0 }
 0x31f   :  { %818 = vst [vmem:[#allocation10] sm:$0xff] %v939_v37  ;;  %v942_v40 = vadd.f32 %v941_v39, %v940_v38 }
 0x321   :  { %819 = vst [vmem:[#allocation10 + $0x8] sm:$0xff] %v942_v40 }
 0x323   :  { %v943_v41 = vpop.f32.mrb[8].mxu1 }
 0x324   :  { %v944_v42 = vpop.f32.mrb[9].mxu1 }
 0x325   :  { %v945_v43 = vadd.f32 %v944_v42, %v943_v41  ;;  %v946_v44 = vpop.f32.mrb[10].mxu1 }
 0x326   :  { %v947_v45 = vpop.f32.mrb[11].mxu1 }
 0x327   :  { %820 = vst [vmem:[#allocation10 + $0x10] sm:$0xff] %v945_v43  ;;  %v948_v46 = vadd.f32 %v947_v45, %v946_v44 }
 0x329   :  { %821 = vst [vmem:[#allocation10 + $0x18] sm:$0xff] %v948_v46 }
 0x32a   :  { %1187 = shalt.err (!%p1184_p8)
}
 0x32b   :  { %s1188_s25 = scalar_lea.hbm %s1343_s5, 512 }
 0x32c   :  { %p1189_p9 = scmp.ne.s32.totalorder %s1343_s5, %s1188_s25  ;;  %p1192_p10 = scmp.lt.u32.totalorder %s1188_s25, %s1343_s5 }
 0x32e   :  { %p1194_p11 = pnand %p1192_p10, %p1189_p9 }
 0x330   :  { %1197 = shalt.err (!%p1194_p11)
}
 0x331   :  { %833 = dma.vmem_to_hbm [thread:$0]  %s828_s21, 512, %s1343_s5, [#allocation4], %s1207_s28, %s1207_s28, %s1208_s29  }
 0x332   :  { %1204 = dma.done.wait [#allocation4], 512  }
 0x333   :  { %1205 = vsyncadd [#allocation4], 4294966784 }
 0x334   :  { %837 = vsyncpa [#allocation3], 1 }
 0x335   :  { %838 = vsyncpa [#allocation6], 1 }
 0x336   :  { %839 = vsyncpa [#allocation9], 1 }
 0x337   :  { %840 = vsyncpa [#allocation4], 1 }

// kernel: tpu_custom_call.1
= control target key start
LH: loop header
LB: loop body
LE: loop exit
PB: predicated region body
PF: predicated region fallthrough
CT: control target
= control target key end

     0   :  { %10 = vsyncpa [#allocation3], 0  ;;  %s1338_s0 = inlined_call_operand.hbm [shape: f32[32,256], index: 0, kind: input, shape index: {}]   ;;  %s1339_s1 = inlined_call_operand.hbm [shape: bf16[256,256], index: 1, kind: input, shape index: {}]   ;;  %s1340_s2 = inlined_call_operand.hbm [shape: bf16[256,256], index: 2, kind: input, shape index: {}]   ;;  %s1341_s3 = inlined_call_operand.vmem [shape: f32[2,256], index: 3, kind: input, shape index: {}]   ;;  %s1342_s4 = inlined_call_operand.hbm [shape: bf16[256,128], index: 4, kind: input, shape index: {}]   ;;  %s1343_s5 = inlined_call_operand.hbm [shape: f32[32,128], index: 5, kind: output, shape index: {}]  }
   0x1   :  { %11 = vsyncpa [#allocation6], 0 }
   0x2   :  { %12 = vsyncpa [#allocation9], 0 }
   0x3   :  { %13 = vsyncpa [#allocation4], 0  ;;  %s1206_s18 = smov [#allocation5]   ;;  %s1088_s22 = scalar_lea.hbm %s1339_s1, 4096 }
   0x4   :  { %s31_s19 = sshll.u32 %s1206_s18, 4  ;;  %p1089_p0 = scmp.ne.s32.totalorder %s1339_s1, %s1088_s22  ;;  %s32_s19 = int_to_ptr.vmem [resolvable:$true] %s31_s19 }
   0x5   :  { %p1092_p1 = scmp.lt.u32.totalorder %s1088_s22, %s1339_s1 }
   0x7   :  { %p1094_p2 = pnand %p1092_p1, %p1089_p0 }
   0x9   :  { %1097 = shalt.err (!%p1094_p2)
}
   0xa   :  { %s1098_s27 = scalar_lea.vmem %s32_s19, 4096  ;;  %p1103_p4 = scmp.lt.s32.totalorder %s32_s19, %s32_s19 }
   0xb   :  { %p1099_p3 = scmp.ne.s32.totalorder %s32_s19, %s1098_s27  ;;  %p1104_p5 = scmp.lt.s32.totalorder %s1098_s27, %s1098_s27 }
   0xd   :  { %p1105_p6 = por %p1104_p5, %p1103_p4 }
   0xf   :  { %p1106_p7 = pnand %p1105_p6, %p1099_p3 }
  0x11   :  { %1109 = shalt.err (!%p1106_p7)
}
  0x12   :  { %s1207_s28 = smov 128   ;;  %s1208_s29 = smov 8  }
  0x13   :  { %37 = dma.hbm_to_vmem [thread:$0]  %s1339_s1, 4096, %s32_s19, [#allocation6], %s1207_s28, %s1207_s28, %s1208_s29  }
  0x14   :  { %s1209_s7 = smov [#allocation2]   ;;  %s1110_s11 = scalar_lea.hbm %s1338_s0, 1024 }
  0x15   :  { %s19_s8 = sshll.u32 %s1209_s7, 4  ;;  %p1111_p8 = scmp.ne.s32.totalorder %s1338_s0, %s1110_s11  ;;  %s20_s8 = int_to_ptr.vmem [resolvable:$true] %s19_s8 }
  0x16   :  { %p1114_p9 = scmp.lt.u32.totalorder %s1110_s11, %s1338_s0 }
  0x18   :  { %p1116_p10 = pnand %p1114_p9, %p1111_p8 }
  0x1a   :  { %1119 = shalt.err (!%p1116_p10)
}
  0x1b   :  { %s1120_s16 = scalar_lea.vmem %s20_s8, 1024  ;;  %p1125_p12 = scmp.lt.s32.totalorder %s20_s8, %s20_s8 }
  0x1c   :  { %p1121_p11 = scmp.ne.s32.totalorder %s20_s8, %s1120_s16  ;;  %p1126_p13 = scmp.lt.s32.totalorder %s1120_s16, %s1120_s16 }
  0x1e   :  { %p1127_p0 = por %p1126_p13, %p1125_p12 }
  0x20   :  { %p1128_p1 = pnand %p1127_p0, %p1121_p11 }
  0x22   :  { %1131 = shalt.err (!%p1128_p1)
}
  0x23   :  { %s1210_s1 = smov 256   ;;  %s1211_s17 = smov 16  }
  0x24   :  { %25 = dma.hbm_to_vmem [thread:$0]  %s1338_s0, 1024, %s20_s8, [#allocation3], %s1210_s1, %s1210_s1, %s1211_s17  }
  0x25   :  { %s1212_s20 = smov [#allocation7]   ;;  %s1213_s22 = smov [#allocation8]  }
  0x26   :  { %s43_s21 = sshll.u32 %s1212_s20, 4  ;;  %s57_s23 = sshll.u32 %s1213_s22, 4  ;;  %s44_s21 = int_to_ptr.vmem [resolvable:$true] %s43_s21  ;;  %s1274_s23 = int_to_ptr.vmem [resolvable:$true] %s57_s23 }
  0x27   :  { %s1132_s26 = scalar_lea.hbm %s1340_s2, 4096 }
  0x28   :  { %p1133_p2 = scmp.ne.s32.totalorder %s1340_s2, %s1132_s26  ;;  %p1136_p3 = scmp.lt.u32.totalorder %s1132_s26, %s1340_s2 }
  0x2a   :  { %p1138_p4 = pnand %p1136_p3, %p1133_p2 }
  0x2c   :  { %1141 = shalt.err (!%p1138_p4)
}
  0x2d   :  { %s1142_s0 = scalar_lea.vmem %s44_s21, 4096  ;;  %p1147_p6 = scmp.lt.s32.totalorder %s44_s21, %s44_s21 }
  0x2e   :  { %p1143_p5 = scmp.ne.s32.totalorder %s44_s21, %s1142_s0  ;;  %p1148_p7 = scmp.lt.s32.totalorder %s1142_s0, %s1142_s0 }
  0x30   :  { %p1149_p8 = por %p1148_p7, %p1147_p6 }
  0x32   :  { %p1150_p9 = pnand %p1149_p8, %p1143_p5 }
  0x34   :  { %1153 = shalt.err (!%p1150_p9)
}
  0x35   :  { %49 = dma.hbm_to_vmem [thread:$0]  %s1340_s2, 4096, %s44_s21, [#allocation6], %s1207_s28, %s1207_s28, %s1208_s29  }
  0x36   :  { %s1154_s12 = scalar_lea.hbm %s1342_s4, 2048 }
  0x37   :  { %p1155_p10 = scmp.ne.s32.totalorder %s1342_s4, %s1154_s12  ;;  %p1158_p11 = scmp.lt.u32.totalorder %s1154_s12, %s1342_s4 }
  0x39   :  { %p1160_p12 = pnand %p1158_p11, %p1155_p10 }
  0x3b   :  { %1163 = shalt.err (!%p1160_p12)
}
  0x3c   :  { %s1164_s1 = scalar_lea.vmem %s1274_s23, 2048  ;;  %p1169_p0 = scmp.lt.s32.totalorder %s1274_s23, %s1274_s23 }
  0x3d   :  { %p1165_p13 = scmp.ne.s32.totalorder %s1274_s23, %s1164_s1  ;;  %p1170_p1 = scmp.lt.s32.totalorder %s1164_s1, %s1164_s1 }
  0x3f   :  { %p1171_p2 = por %p1170_p1, %p1169_p0 }
  0x41   :  { %p1172_p3 = pnand %p1171_p2, %p1165_p13 }
  0x43   :  { %1175 = shalt.err (!%p1172_p3)
}
  0x44   :  { %s1214_s2 = smov 64   ;;  %s1215_s17 = smov 4  }
  0x45   :  { %63 = dma.hbm_to_vmem [thread:$0]  %s1342_s4, 2048, %s1274_s23, [#allocation9], %s1214_s2, %s1214_s2, %s1215_s17  }
  0x46   :  { %1198 = dma.done.wait [#allocation3], 1024  }
  0x47   :  { %1199 = vsyncadd [#allocation3], 4294966272 }
  0x48   :  { %1200 = dma.done.wait [#allocation6], 8192  }
  0x49   :  { %1201 = vsyncadd [#allocation6], 4294959104 }
  0x4a   :  { %1202 = dma.done.wait [#allocation9], 2048  }
  0x4b   :  { %1203 = vsyncadd [#allocation9], 4294965248  ;;  %v976_v0 = vld [vmem:[#allocation5 + $0x4] ss:$8 sps:$4 sm:$0xff]   ;;  %v978_v1 = vld [vmem:[#allocation5] ss:$8 sps:$4 sm:$0xff]  }
  0x4c   :  { %301 = vmatprep.subr.bf16.mxu0 %v976_v0  ;;  %v979_v2 = vld [vmem:[#allocation5 + $0x14] ss:$8 sps:$4 sm:$0xff]   ;;  %v981_v3 = vld [vmem:[#allocation5 + $0x10] ss:$8 sps:$4 sm:$0xff]   ;;  %v982_v4 = vld [vmem:[#allocation5 + $0x24] ss:$8 sps:$4 sm:$0xff]  }
  0x4d   :  { %302 = vmatpush1.bf16.msra.mxu0 %v978_v1  ;;  %v984_v5 = vld [vmem:[#allocation5 + $0x20] ss:$8 sps:$4 sm:$0xff]   ;;  %v985_v6 = vld [vmem:[#allocation5 + $0x34] ss:$8 sps:$4 sm:$0xff]   ;;  %v987_v7 = vld [vmem:[#allocation5 + $0x30] ss:$8 sps:$4 sm:$0xff]  }
  0x4e   :  { %303 = vmatprep.subr.bf16.mxu0 %v979_v2  ;;  %v988_v8 = vld [vmem:[#allocation5 + $0x44] ss:$8 sps:$4 sm:$0xff]   ;;  %v990_v9 = vld [vmem:[#allocation5 + $0x40] ss:$8 sps:$4 sm:$0xff]   ;;  %v991_v10 = vld [vmem:[#allocation5 + $0x54] ss:$8 sps:$4 sm:$0xff]  }
  0x4f   :  { %v993_v11 = vld [vmem:[#allocation5 + $0x50] ss:$8 sps:$4 sm:$0xff]   ;;  %v994_v12 = vld [vmem:[#allocation5 + $0x64] ss:$8 sps:$4 sm:$0xff]   ;;  %v996_v16 = vld [vmem:[#allocation5 + $0x60] ss:$8 sps:$4 sm:$0xff]  }
  0x50   :  { %v78_v13 = vld [vmem:[#allocation2 + $0x8] sm:$0xff]  ;;  %v80_v14 = vld [vmem:[#allocation2 + $0x18] sm:$0xff]  ;;  %v77_v54 = vld [vmem:[#allocation2] sm:$0xff] }
  0x51   :  { %304 = vmatpush1.bf16.msra.mxu0 %v981_v3  ;;  %v86_v15 = vpack.c.bf16 %v80_v14, %v78_v13  ;;  %v997_v17 = vld [vmem:[#allocation5 + $0x74] ss:$8 sps:$4 sm:$0xff]   ;;  %v1024_v18 = vld [vmem:[#allocation7 + $0x4] ss:$8 sps:$4 sm:$0xff]   ;;  %v1026_v19 = vld [vmem:[#allocation7] ss:$8 sps:$4 sm:$0xff]  }
  0x52   :  { %305 = vmatprep.subr.bf16.mxu0 %v982_v4  ;;  %v999_v20 = vld [vmem:[#allocation5 + $0x70] ss:$8 sps:$4 sm:$0xff]   ;;  %576 = vmatprep.subr.bf16.mxu1 %v1024_v18  ;;  %v1027_v21 = vld [vmem:[#allocation7 + $0x14] ss:$8 sps:$4 sm:$0xff]   ;;  %v1000_v22 = vld [vmem:[#allocation5 + $0x84] ss:$8 sps:$4 sm:$0xff]  }
  0x53   :  { %333 = vmatprep.mubr.bf16.mxu0 %v86_v15  ;;  %577 = vmatpush1.bf16.msra.mxu1 %v1026_v19  ;;  %v1029_v23 = vld [vmem:[#allocation7 + $0x10] ss:$8 sps:$4 sm:$0xff]   ;;  %v1030_v24 = vld [vmem:[#allocation7 + $0x24] ss:$8 sps:$4 sm:$0xff]   ;;  %v1002_v25 = vld [vmem:[#allocation5 + $0x80] ss:$8 sps:$4 sm:$0xff]  }
  0x54   :  { %578 = vmatprep.subr.bf16.mxu1 %v1027_v21  ;;  %v1003_v26 = vld [vmem:[#allocation5 + $0x94] ss:$8 sps:$4 sm:$0xff]   ;;  %v1032_v27 = vld [vmem:[#allocation7 + $0x20] ss:$8 sps:$4 sm:$0xff]   ;;  %v1005_v29 = vld [vmem:[#allocation5 + $0x90] ss:$8 sps:$4 sm:$0xff]  }
  0x55   :  { %306 = vmatpush1.bf16.msra.mxu0 %v984_v5  ;;  %v1033_v28 = vld [vmem:[#allocation7 + $0x34] ss:$8 sps:$4 sm:$0xff]   ;;  %v1006_v30 = vld [vmem:[#allocation5 + $0xa4] ss:$8 sps:$4 sm:$0xff]   ;;  %v1035_v31 = vld [vmem:[#allocation7 + $0x30] ss:$8 sps:$4 sm:$0xff]  }
  0x56   :  { %307 = vmatprep.subr.bf16.mxu0 %v985_v6  ;;  %v1036_v32 = vld [vmem:[#allocation7 + $0x44] ss:$8 sps:$4 sm:$0xff]   ;;  %v1008_v33 = vld [vmem:[#allocation5 + $0xa0] ss:$8 sps:$4 sm:$0xff]   ;;  %v1009_v34 = vld [vmem:[#allocation5 + $0xb4] ss:$8 sps:$4 sm:$0xff]  }
  0x57   :  { %579 = vmatpush1.bf16.msra.mxu1 %v1029_v23  ;;  %v1038_v35 = vld [vmem:[#allocation7 + $0x40] ss:$8 sps:$4 sm:$0xff]   ;;  %v1039_v36 = vld [vmem:[#allocation7 + $0x54] ss:$8 sps:$4 sm:$0xff]   ;;  %v1011_v37 = vld [vmem:[#allocation5 + $0xb0] ss:$8 sps:$4 sm:$0xff]   ;;  %v123_v23 = vlaneseq }
  0x58   :  { %580 = vmatprep.subr.bf16.mxu1 %v1030_v24  ;;  %v1012_v38 = vld [vmem:[#allocation5 + $0xc4] ss:$8 sps:$4 sm:$0xff]   ;;  %v1041_v39 = vld [vmem:[#allocation7 + $0x50] ss:$8 sps:$4 sm:$0xff]   ;;  %v1014_v41 = vld [vmem:[#allocation5 + $0xc0] ss:$8 sps:$4 sm:$0xff]  }
  0x59   :  { %308 = vmatpush1.bf16.msra.mxu0 %v987_v7  ;;  %v1042_v40 = vld [vmem:[#allocation7 + $0x64] ss:$8 sps:$4 sm:$0xff]   ;;  %v1044_v42 = vld [vmem:[#allocation7 + $0x60] ss:$8 sps:$4 sm:$0xff]   ;;  %v1015_v43 = vld [vmem:[#allocation5 + $0xd4] ss:$8 sps:$4 sm:$0xff]  }
  0x5a   :  { %309 = vmatprep.subr.bf16.mxu0 %v988_v8  ;;  %v1045_v44 = vld [vmem:[#allocation7 + $0x74] ss:$8 sps:$4 sm:$0xff]   ;;  %v1017_v45 = vld [vmem:[#allocation5 + $0xd0] ss:$8 sps:$4 sm:$0xff]   ;;  %v1018_v47 = vld [vmem:[#allocation5 + $0xe4] ss:$8 sps:$4 sm:$0xff]  }
  0x5b   :  { %581 = vmatpush1.bf16.msra.mxu1 %v1032_v27  ;;  %v1047_v46 = vld [vmem:[#allocation7 + $0x70] ss:$8 sps:$4 sm:$0xff]   ;;  %v1048_v48 = vld [vmem:[#allocation7 + $0x84] ss:$8 sps:$4 sm:$0xff]   ;;  %v1020_v49 = vld [vmem:[#allocation5 + $0xe0] ss:$8 sps:$4 sm:$0xff]  }
  0x5c   :  { %582 = vmatprep.subr.bf16.mxu1 %v1033_v28  ;;  %v1050_v50 = vld [vmem:[#allocation7 + $0x80] ss:$8 sps:$4 sm:$0xff]   ;;  %v1021_v51 = vld [vmem:[#allocation5 + $0xf4] ss:$8 sps:$4 sm:$0xff]   ;;  %v1023_v53 = vld [vmem:[#allocation5 + $0xf0] ss:$8 sps:$4 sm:$0xff]  }
  0x5d   :  { %310 = vmatpush1.bf16.msra.mxu0 %v990_v9  ;;  %v1051_v52 = vld [vmem:[#allocation7 + $0x94] ss:$8 sps:$4 sm:$0xff]   ;;  %v1053_v56 = vld [vmem:[#allocation7 + $0x90] ss:$8 sps:$4 sm:$0xff]   ;;  %v82_v57 = vld [vmem:[#allocation2 + $0x28] sm:$0xff]  ;;  %v1308_v24 = vshrl.u32 %v123_v23, 7 }
  0x5e   :  { %311 = vmatprep.subr.bf16.mxu0 %v991_v10  ;;  %v79_v55 = vld [vmem:[#allocation2 + $0x10] sm:$0xff]  ;;  %v84_v58 = vld [vmem:[#allocation2 + $0x38] sm:$0xff]  ;;  %v1054_v59 = vld [vmem:[#allocation7 + $0xa4] ss:$8 sps:$4 sm:$0xff]  }
  0x5f   :  { %583 = vmatpush1.bf16.msra.mxu1 %v1035_v31  ;;  %v85_v60 = vpack.c.bf16 %v79_v55, %v77_v54  ;;  %v88_v61 = vpack.c.bf16 %v84_v58, %v82_v57  ;;  %v1056_v62 = vld [vmem:[#allocation7 + $0xa0] ss:$8 sps:$4 sm:$0xff]   ;;  %v1057_v63 = vld [vmem:[#allocation7 + $0xb4] ss:$8 sps:$4 sm:$0xff]   ;;  %v1059_v2 = vld [vmem:[#allocation7 + $0xb0] ss:$8 sps:$4 sm:$0xff]  }
  0x60   :  { %584 = vmatprep.subr.bf16.mxu1 %v1036_v32  ;;  %v81_v0 = vld [vmem:[#allocation2 + $0x20] sm:$0xff]  ;;  %v83_v1 = vld [vmem:[#allocation2 + $0x30] sm:$0xff]  ;;  %v1074_v14 = vld [vmem:[#allocation8 + $0x48] sm:$0xff]   ;;  %v129_v27 = vsub.s32 2, %v1308_v24 }
  0x61   :  { %312 = vmatpush1.bf16.msra.mxu0 %v993_v11  ;;  %v1060_v3 = vld [vmem:[#allocation7 + $0xc4] ss:$8 sps:$4 sm:$0xff]   ;;  %v87_v4 = vpack.c.bf16 %v83_v1, %v81_v0  ;;  %v1062_v5 = vld [vmem:[#allocation7 + $0xc0] ss:$8 sps:$4 sm:$0xff]   ;;  %v1063_v6 = vld [vmem:[#allocation7 + $0xd4] ss:$8 sps:$4 sm:$0xff]  }
  0x62   :  { %313 = vmatprep.subr.bf16.mxu0 %v994_v12  ;;  %v1065_v7 = vld [vmem:[#allocation7 + $0xd0] ss:$8 sps:$4 sm:$0xff]   ;;  %v1066_v8 = vld [vmem:[#allocation7 + $0xe4] ss:$8 sps:$4 sm:$0xff]   ;;  %v1068_v9 = vld [vmem:[#allocation7 + $0xe0] ss:$8 sps:$4 sm:$0xff]  }
  0x63   :  { %585 = vmatpush1.bf16.msra.mxu1 %v1038_v35  ;;  %v1069_v10 = vld [vmem:[#allocation7 + $0xf4] ss:$8 sps:$4 sm:$0xff]   ;;  %v1071_v11 = vld [vmem:[#allocation7 + $0xf0] ss:$8 sps:$4 sm:$0xff]   ;;  %v1072_v12 = vld [vmem:[#allocation8 + $0x40] sm:$0xff]   ;;  %v400_v1 = vsub.s32 1, %v1308_v24 }
  0x64   :  { %586 = vmatprep.subr.bf16.mxu1 %v1039_v36  ;;  %v1073_v13 = vld [vmem:[#allocation8] sm:$0xff]   ;;  %v1075_v15 = vld [vmem:[#allocation8 + $0x8] sm:$0xff]   ;;  %v1078_v18 = vld [vmem:[#allocation8 + $0x58] sm:$0xff]  }
  0x65   :  { %314 = vmatpush1.bf16.msra.mxu0 %v996_v16  ;;  %v1076_v16 = vld [vmem:[#allocation8 + $0x50] sm:$0xff]   ;;  %v1079_v19 = vld [vmem:[#allocation8 + $0x18] sm:$0xff]   ;;  %v1081_v21 = vld [vmem:[#allocation8 + $0x20] sm:$0xff]  }
  0x66   :  { %315 = vmatprep.subr.bf16.mxu0 %v997_v17  ;;  %v1077_v17 = vld [vmem:[#allocation8 + $0x10] sm:$0xff]   ;;  %v1087_v0 = vld [vmem:[#allocation8 + $0x38] sm:$0xff]  }
  0x67   :  { %587 = vmatpush1.bf16.msra.mxu1 %v1041_v39 }
  0x68   :  { %588 = vmatprep.subr.bf16.mxu1 %v1042_v40 }
  0x69   :  { %316 = vmatpush1.bf16.msra.mxu0 %v999_v20  ;;  %v1080_v20 = vld [vmem:[#allocation8 + $0x60] sm:$0xff]  }
  0x6a   :  { %317 = vmatprep.subr.bf16.mxu0 %v1000_v22  ;;  %v1082_v22 = vld [vmem:[#allocation8 + $0x68] sm:$0xff]  }
  0x6b   :  { %589 = vmatpush1.bf16.msra.mxu1 %v1044_v42 }
  0x6c   :  { %590 = vmatprep.subr.bf16.mxu1 %v1045_v44 }
  0x6d   :  { %318 = vmatpush1.bf16.msra.mxu0 %v1002_v25  ;;  %v125_v25 = vsub.s32 0, %v1308_v24 }
  0x6e   :  { %319 = vmatprep.subr.bf16.mxu0 %v1003_v26  ;;  %v1314_v26 = vld [vmem:[%s1341_s3] sm:$0xf]  ;;  %s1216_s3 = smov [#allocation10]  }
  0x6f   :  { %591 = vmatpush1.bf16.msra.mxu1 %v1047_v46  ;;  %v126_v28 = vrot.slane %v1314_v26, %v125_v25  ;;  %s827_s21 = sshll.u32 %s1216_s3, 4  ;;  %s828_s21 = int_to_ptr.vmem [resolvable:$true] %s827_s21 }
  0x70   :  { %592 = vmatprep.subr.bf16.mxu1 %v1048_v48  ;;  %s1176_s22 = scalar_lea.vmem %s828_s21, 512  ;;  %p1181_p5 = scmp.lt.s32.totalorder %s828_s21, %s828_s21 }
  0x71   :  { %320 = vmatpush1.bf16.msra.mxu0 %v1005_v29  ;;  %v130_v29 = vrot.slane %v1314_v26, %v129_v27  ;;  %p1177_p4 = scmp.ne.s32.totalorder %s828_s21, %s1176_s22  ;;  %p1182_p6 = scmp.lt.s32.totalorder %s1176_s22, %s1176_s22 }
  0x72   :  { %321 = vmatprep.subr.bf16.mxu0 %v1006_v30  ;;  %v136_v30 = vrot.slane %v126_v28, %v125_v25 }
  0x73   :  { %593 = vmatpush1.bf16.msra.mxu1 %v1050_v50  ;;  %v140_v31 = vrot.slane %v130_v29, %v125_v25  ;;  %p1183_p7 = por %p1182_p6, %p1181_p5 }
  0x74   :  { %594 = vmatprep.subr.bf16.mxu1 %v1051_v52 }
  0x75   :  { %322 = vmatpush1.bf16.msra.mxu0 %v1008_v33  ;;  %p1184_p8 = pnand %p1183_p7, %p1177_p4 }
  0x76   :  { %323 = vmatprep.subr.bf16.mxu0 %v1009_v34 }
  0x77   :  { %595 = vmatpush1.bf16.msra.mxu1 %v1053_v56 }
  0x78   :  { %596 = vmatprep.subr.bf16.mxu1 %v1054_v59 }
  0x79   :  { %324 = vmatpush1.bf16.msra.mxu0 %v1011_v37 }
  0x7a   :  { %325 = vmatprep.subr.bf16.mxu0 %v1012_v38 }
  0x7b   :  { %597 = vmatpush1.bf16.msra.mxu1 %v1056_v62  ;;  %v1085_v62 = vld [vmem:[#allocation8 + $0x30] sm:$0xff]  }
  0x7c   :  { %598 = vmatprep.subr.bf16.mxu1 %v1057_v63  ;;  %v1086_v63 = vld [vmem:[#allocation8 + $0x78] sm:$0xff]  }
  0x7d   :  { %326 = vmatpush1.bf16.msra.mxu0 %v1014_v41 }
  0x7e   :  { %327 = vmatprep.subr.bf16.mxu0 %v1015_v43 }
  0x7f   :  { %599 = vmatpush1.bf16.msra.mxu1 %v1059_v2  ;;  %v404_v2 = vsub.s32 3, %v1308_v24 }
  0x80   :  { %600 = vmatprep.subr.bf16.mxu1 %v1060_v3  ;;  %v401_v3 = vrot.slane %v1314_v26, %v400_v1 }
  0x81   :  { %328 = vmatpush1.bf16.msra.mxu0 %v1017_v45 }
  0x82   :  { %329 = vmatprep.subr.bf16.mxu0 %v1018_v47 }
  0x83   :  { %601 = vmatpush1.bf16.msra.mxu1 %v1062_v5  ;;  %v411_v5 = vrot.slane %v401_v3, %v400_v1 }
  0x84   :  { %602 = vmatprep.subr.bf16.mxu1 %v1063_v6 }
  0x85   :  { %330 = vmatpush1.bf16.msra.mxu0 %v1020_v49 }
  0x86   :  { %331 = vmatprep.subr.bf16.mxu0 %v1021_v51 }
  0x87   :  { %603 = vmatpush1.bf16.msra.mxu1 %v1065_v7 }
  0x88   :  { %604 = vmatprep.subr.bf16.mxu1 %v1066_v8 }
  0x89   :  { %332 = vmatpush1.bf16.msra.mxu0 %v1023_v53 }
  0x8a   :  { %921 = vmatprep.subr.bf16.mxu0 %v1072_v12 }
  0x8b   :  { %605 = vmatpush1.bf16.msra.mxu1 %v1068_v9 }
  0x8c   :  { %334 = vmatmul.mubr.bf16.vlgmr.msra.gmra.mrb[0].mxu0 %v85_v60  ;;  %606 = vmatprep.subr.bf16.mxu1 %v1069_v10  ;;  %v1083_v60 = vld [vmem:[#allocation8 + $0x28] sm:$0xff]  }
  0x8d   :  { %343 = vmatprep.mubr.bf16.mxu0 %v88_v61  ;;  %922 = vmatpush3.bf16.msra.mxu0 %v1073_v13  ;;  %v1084_v61 = vld [vmem:[#allocation8 + $0x70] sm:$0xff]  }
  0x8e   :  { %923 = vmatprep.subr.bf16.mxu0 %v1074_v14 }
  0x8f   :  { %607 = vmatpush1.bf16.msra.mxu1 %v1071_v11 }
  0x90   :  { %949 = vmatprep.subr.bf16.mxu1 %v1072_v12 }
  0x91   :  { %924 = vmatpush3.bf16.msra.mxu0 %v1075_v15 }
  0x92   :  { %925 = vmatprep.subr.bf16.mxu0 %v1076_v16 }
  0x94   :  { %344 = vmatmul.mubr.bf16.gmra.mrb[4].mxu0 %v87_v4  ;;  %v405_v4 = vrot.slane %v1314_v26, %v404_v2 }
  0x95   :  { %926 = vmatpush3.bf16.msra.mxu0 %v1077_v17 }
  0x96   :  { %927 = vmatprep.subr.bf16.mxu0 %v1078_v18  ;;  %v415_v6 = vrot.slane %v405_v4, %v400_v1 }
  0x99   :  { %928 = vmatpush3.bf16.msra.mxu0 %v1079_v19 }
  0x9a   :  { %929 = vmatprep.subr.bf16.mxu0 %v1080_v20 }
  0x9d   :  { %930 = vmatpush3.bf16.msra.mxu0 %v1081_v21 }
  0x9e   :  { %931 = vmatprep.subr.bf16.mxu0 %v1082_v22 }
  0xa1   :  { %932 = vmatpush3.bf16.msra.mxu0 %v1083_v60 }
  0xa2   :  { %933 = vmatprep.subr.bf16.mxu0 %v1084_v61 }
  0xa5   :  { %934 = vmatpush3.bf16.msra.mxu0 %v1085_v62 }
  0xa6   :  { %935 = vmatprep.subr.bf16.mxu0 %v1086_v63 }
  0xa9   :  { %936 = vmatpush3.bf16.msra.mxu0 %v1087_v0 }
 0x15f   :  { %v335_v32 = vpop.f32.mrb[0].mxu0 }
 0x160   :  { %v336_v33 = vadd.f32 %v335_v32, %v136_v30  ;;  %v337_v34 = vpop.f32.mrb[1].mxu0 }
 0x161   :  { %v338_v35 = vadd.f32 %v337_v34, %v140_v31  ;;  %v339_v36 = vpop.f32.mrb[2].mxu0 }
 0x162   :  { %v340_v37 = vadd.f32 %v339_v36, %v136_v30  ;;  %v341_v38 = vpop.f32.mrb[3].mxu0  ;;  %v354_v40 = vmax.f32 %v336_v33, 0.0 }
 0x163   :  { %v342_v39 = vadd.f32 %v341_v38, %v140_v31  ;;  %v355_v42 = vmax.f32 %v338_v35, 0.0 }
 0x164   :  { %v356_v41 = vmax.f32 %v340_v37, 0.0 }
 0x165   :  { %v357_v43 = vmax.f32 %v342_v39, 0.0 }
 0x166   :  { %v362_v44 = vpack.c.bf16 %v356_v41, %v354_v40 }
 0x167   :  { %v345_v45 = vpop.f32.mrb[4].mxu0  ;;  %v363_v46 = vpack.c.bf16 %v357_v43, %v355_v42 }
 0x168   :  { %v346_v47 = vadd.f32 %v345_v45, %v136_v30  ;;  %v347_v48 = vpop.f32.mrb[5].mxu0 }
 0x169   :  { %v348_v49 = vadd.f32 %v347_v48, %v140_v31  ;;  %v349_v50 = vpop.f32.mrb[6].mxu0  ;;  %608 = vmatprep.mubr.bf16.mxu1 %v363_v46 }
 0x16a   :  { %v350_v51 = vadd.f32 %v349_v50, %v136_v30  ;;  %v351_v52 = vpop.f32.mrb[7].mxu0  ;;  %609 = vmatmul.mubr.bf16.vlgmr.msra.gmra.mrb[0].mxu1 %v362_v44  ;;  %v358_v54 = vmax.f32 %v346_v47, 0.0 }
 0x16b   :  { %v352_v53 = vadd.f32 %v351_v52, %v140_v31  ;;  %957 = vmatpush3.bf16.msra.mxu1 %v1073_v13  ;;  %v359_v56 = vmax.f32 %v348_v49, 0.0 }
 0x16c   :  { %v360_v55 = vmax.f32 %v350_v51, 0.0  ;;  %950 = vmatprep.subr.bf16.mxu1 %v1074_v14 }
 0x16d   :  { %v361_v57 = vmax.f32 %v352_v53, 0.0 }
 0x16e   :  { %v364_v58 = vpack.c.bf16 %v360_v55, %v358_v54 }
 0x16f   :  { %v365_v59 = vpack.c.bf16 %v361_v57, %v359_v56  ;;  %958 = vmatpush3.bf16.msra.mxu1 %v1075_v15 }
 0x170   :  { %951 = vmatprep.subr.bf16.mxu1 %v1076_v16 }
 0x171   :  { %618 = vmatprep.mubr.bf16.mxu1 %v365_v59 }
 0x172   :  { %619 = vmatmul.mubr.bf16.gmra.mrb[4].mxu1 %v364_v58 }
 0x173   :  { %959 = vmatpush3.bf16.msra.mxu1 %v1077_v17 }
 0x174   :  { %952 = vmatprep.subr.bf16.mxu1 %v1078_v18 }
 0x177   :  { %960 = vmatpush3.bf16.msra.mxu1 %v1079_v19 }
 0x178   :  { %953 = vmatprep.subr.bf16.mxu1 %v1080_v20 }
 0x17b   :  { %961 = vmatpush3.bf16.msra.mxu1 %v1081_v21 }
 0x17c   :  { %954 = vmatprep.subr.bf16.mxu1 %v1082_v22 }
 0x17f   :  { %962 = vmatpush3.bf16.msra.mxu1 %v1083_v60 }
 0x180   :  { %955 = vmatprep.subr.bf16.mxu1 %v1084_v61 }
 0x183   :  { %963 = vmatpush3.bf16.msra.mxu1 %v1085_v62 }
 0x184   :  { %956 = vmatprep.subr.bf16.mxu1 %v1086_v63 }
 0x187   :  { %964 = vmatpush3.bf16.msra.mxu1 %v1087_v0 }
 0x23d   :  { %v610_v7 = vpop.f32.mrb[0].mxu1 }
 0x23e   :  { %v611_v8 = vadd.f32 %v610_v7, %v411_v5  ;;  %v612_v9 = vpop.f32.mrb[1].mxu1 }
 0x23f   :  { %v613_v10 = vadd.f32 %v612_v9, %v415_v6  ;;  %v614_v11 = vpop.f32.mrb[2].mxu1 }
 0x240   :  { %v615_v12 = vadd.f32 %v614_v11, %v411_v5  ;;  %v616_v13 = vpop.f32.mrb[3].mxu1  ;;  %v629_v15 = vmax.f32 %v611_v8, 0.0 }
 0x241   :  { %v617_v14 = vadd.f32 %v616_v13, %v415_v6  ;;  %v630_v17 = vmax.f32 %v613_v10, 0.0 }
 0x242   :  { %v631_v16 = vmax.f32 %v615_v12, 0.0 }
 0x243   :  { %v632_v18 = vmax.f32 %v617_v14, 0.0 }
 0x244   :  { %v637_v19 = vpack.c.bf16 %v631_v16, %v629_v15 }
 0x245   :  { %v638_v20 = vpack.c.bf16 %v632_v18, %v630_v17  ;;  %v620_v21 = vpop.f32.mrb[4].mxu1 }
 0x246   :  { %v621_v22 = vadd.f32 %v620_v21, %v411_v5  ;;  %v622_v23 = vpop.f32.mrb[5].mxu1 }
 0x247   :  { %v623_v24 = vadd.f32 %v622_v23, %v415_v6  ;;  %v624_v25 = vpop.f32.mrb[6].mxu1  ;;  %801 = vmatprep.mubr.bf16.mxu0 %v638_v20 }
 0x248   :  { %v625_v26 = vadd.f32 %v624_v25, %v411_v5  ;;  %v626_v27 = vpop.f32.mrb[7].mxu1  ;;  %802 = vmatmul.mubr.bf16.vlgmr.msra.gmra.mrb[8].mxu0 %v637_v19  ;;  %v633_v29 = vmax.f32 %v621_v22, 0.0 }
 0x249   :  { %v627_v28 = vadd.f32 %v626_v27, %v415_v6  ;;  %v634_v31 = vmax.f32 %v623_v24, 0.0 }
 0x24a   :  { %v635_v30 = vmax.f32 %v625_v26, 0.0 }
 0x24b   :  { %v636_v32 = vmax.f32 %v627_v28, 0.0 }
 0x24c   :  { %v639_v33 = vpack.c.bf16 %v635_v30, %v633_v29 }
 0x24d   :  { %v640_v34 = vpack.c.bf16 %v636_v32, %v634_v31 }
 0x24f   :  { %809 = vmatprep.mubr.bf16.mxu1 %v640_v34 }
 0x250   :  { %810 = vmatmul.mubr.bf16.vlgmr.msra.gmra.mrb[8].mxu1 %v639_v33 }
 0x31b   :  { %v937_v35 = vpop.f32.mrb[8].mxu0 }
 0x31c   :  { %v938_v36 = vpop.f32.mrb[9].mxu0 }
 0x31d   :  { %v939_v37 = vadd.f32 %v938_v36, %v937_v35  ;;  %v940_v38 = vpop.f32.mrb[10].mxu0 }
 0x31e   :  { %v941_v39 = vpop.f32.mrb[11].mxu0 }
 0x31f   :  { %818 = vst [vmem:[#allocation10] sm:$0xff] %v939_v37  ;;  %v942_v40 = vadd.f32 %v941_v39, %v940_v38 }
 0x321   :  { %819 = vst [vmem:[#allocation10 + $0x8] sm:$0xff] %v942_v40 }
 0x323   :  { %v943_v41 = vpop.f32.mrb[8].mxu1 }
 0x324   :  { %v944_v42 = vpop.f32.mrb[9].mxu1 }
 0x325   :  { %v945_v43 = vadd.f32 %v944_v42, %v943_v41  ;;  %v946_v44 = vpop.f32.mrb[10].mxu1 }
 0x326   :  { %v947_v45 = vpop.f32.mrb[11].mxu1 }
 0x327   :  { %820 = vst [vmem:[#allocation10 + $0x10] sm:$0xff] %v945_v43  ;;  %v948_v46 = vadd.f32 %v947_v45, %v946_v44 }
 0x329   :  { %821 = vst [vmem:[#allocation10 + $0x18] sm:$0xff] %v948_v46 }
 0x32a   :  { %1187 = shalt.err (!%p1184_p8)
}
 0x32b   :  { %s1188_s25 = scalar_lea.hbm %s1343_s5, 512 }
 0x32c   :  { %p1189_p9 = scmp.ne.s32.totalorder %s1343_s5, %s1188_s25  ;;  %p1192_p10 = scmp.lt.u32.totalorder %s1188_s25, %s1343_s5 }
 0x32e   :  { %p1194_p11 = pnand %p1192_p10, %p1189_p9 }
 0x330   :  { %1197 = shalt.err (!%p1194_p11)
}
 0x331   :  { %833 = dma.vmem_to_hbm [thread:$0]  %s828_s21, 512, %s1343_s5, [#allocation4], %s1207_s28, %s1207_s28, %s1208_s29  }
 0x332   :  { %1204 = dma.done.wait [#allocation4], 512  }
 0x333   :  { %1205 = vsyncadd [#allocation4], 4294966784 }
 0x334   :  { %837 = vsyncpa [#allocation3], 1 }
 0x335   :  { %838 = vsyncpa [#allocation6], 1 }
 0x336   :  { %839 = vsyncpa [#allocation9], 1 }
 0x337   :  { %840 = vsyncpa [#allocation4], 1 }

</bundles_post_ra>
